<compile_context>
chip_gen: v5e
topology: v5e:2x2
jax: 0.10.0
libtpu: 0.0.40
codegen_flags: <defaults>
</compile_context>

<pallas_src>
import math

import jax
import jax.numpy as jnp
from jax.experimental import pallas as pl
from jax.experimental.pallas import tpu as pltpu

# ----------------------------- config (small) -------------------------------
VOCAB = 100
PAD_IDX = 1          # RoBERTa padding_idx
MAX_POS = 64
HIDDEN = 32
N_HEADS = 4
HEAD_DIM = HIDDEN // N_HEADS
INTERMEDIATE = 64
N_LAYERS = 2
LN_EPS = 1e-5
BATCH = 2
SEQ = 8
NEG_INF = -1e30


# ------------------------------ fused kernel --------------------------------
def _encoder_kernel(emb_ref, bias_ref, eg_ref, eb_ref,
                    wqkv_ref, bqkv_ref, wo_ref, bo_ref, g1_ref, b1_ref,
                    wi_ref, bi_ref, wf_ref, bf_ref, g2_ref, b2_ref,
                    out_ref, ctx_scr):
    """One grid step == one batch element. All layers fused in-kernel."""

    def ln(x, g, b):
        mean = jnp.mean(x, axis=-1, keepdims=True)
        c = x - mean
        var = jnp.mean(c * c, axis=-1, keepdims=True)
        return c * jax.lax.rsqrt(var + LN_EPS) * g + b

    bias = bias_ref[0]                                  # (1, S) additive key mask
    h = ln(emb_ref[0], eg_ref[...], eb_ref[...])        # (S, H)
    scale = 1.0 / math.sqrt(HEAD_DIM)

    # N_LAYERS is tiny (2): static unroll keeps everything visible to the
    # scheduler; weights are read with static first-axis indices.
    for l in range(N_LAYERS):
        # ---- fused QKV projection: one MXU pass, lane-dense (S, 3H) output ----
        qkv = jnp.dot(h, wqkv_ref[l],
                      preferred_element_type=jnp.float32) + bqkv_ref[l]
        q = qkv[:, 0:HIDDEN]
        k = qkv[:, HIDDEN:2 * HIDDEN]
        v = qkv[:, 2 * HIDDEN:3 * HIDDEN]

        # ---- all-head attention: heads sliced along the lane dim ----
        for hd in range(N_HEADS):
            lo = hd * HEAD_DIM
            q_h = q[:, lo:lo + HEAD_DIM]                # (S, Dh)
            k_h = k[:, lo:lo + HEAD_DIM]
            v_h = v[:, lo:lo + HEAD_DIM]
            # q @ k^T without an explicit transpose of K (contract dim 1 of both)
            s = jax.lax.dot_general(
                q_h, k_h, (((1,), (1,)), ((), ())),
                preferred_element_type=jnp.float32) * scale
            s = s + bias                                # mask pad key columns
            s = s - jnp.max(s, axis=-1, keepdims=True)
            p = jnp.exp(s)
            p = p * pl.reciprocal(jnp.sum(p, axis=-1, keepdims=True),
                                  approx=True)          # EUP slot (free)
            ctx_scr[:, lo:lo + HEAD_DIM] = jnp.dot(
                p, v_h, preferred_element_type=jnp.float32)

        # ---- output proj + residual + LN (fused epilogue) ----
        attn = jnp.dot(ctx_scr[...], wo_ref[l],
                       preferred_element_type=jnp.float32) + bo_ref[l]
        h = ln(attn + h, g1_ref[l], b1_ref[l])

        # ---- FFN (exact erf GELU, matching HF "gelu") + residual + LN ----
        inter = jnp.dot(h, wi_ref[l],
                        preferred_element_type=jnp.float32) + bi_ref[l]
        inter = 0.5 * inter * (1.0 + jax.lax.erf(inter * (1.0 / math.sqrt(2.0))))
        ffn = jnp.dot(inter, wf_ref[l],
                      preferred_element_type=jnp.float32) + bf_ref[l]
        h = ln(ffn + h, g2_ref[l], b2_ref[l])

    out_ref[0] = h.astype(out_ref.dtype)


def _resident_spec(arr):
    """Full-array block, same block for every grid step (weights stay in VMEM)."""
    zeros = (0,) * arr.ndim
    return pl.BlockSpec(arr.shape, lambda b, _z=zeros: _z)


# --------------------------- parameter construction -------------------------
def _normal(key, shape, std=0.02):
    return (std * jax.random.normal(key, shape)).astype(jnp.float32)


def init_params(seed=0):
    key = jax.random.PRNGKey(seed)
    ks = iter(jax.random.split(key, 4 + N_LAYERS * 8))
    word_emb = _normal(next(ks), (VOCAB, HIDDEN)).at[PAD_IDX].set(0.0)
    pos_emb = _normal(next(ks), (MAX_POS, HIDDEN)).at[PAD_IDX].set(0.0)
    type_emb = _normal(next(ks), (HIDDEN,))

    wqkv, bqkv, wo, bo, g1, b1 = [], [], [], [], [], []
    wi, bi, wf, bf, g2, b2 = [], [], [], [], [], []
    for _ in range(N_LAYERS):
        wq = _normal(next(ks), (HIDDEN, HIDDEN))
        wk = _normal(next(ks), (HIDDEN, HIDDEN))
        wv = _normal(next(ks), (HIDDEN, HIDDEN))
        wqkv.append(jnp.concatenate([wq, wk, wv], axis=1))          # (H, 3H)
        bqkv.append(jnp.zeros((1, 3 * HIDDEN), jnp.float32))
        wo.append(_normal(next(ks), (HIDDEN, HIDDEN)))
        bo.append(jnp.zeros((1, HIDDEN), jnp.float32))
        g1.append(jnp.ones((1, HIDDEN), jnp.float32))
        b1.append(jnp.zeros((1, HIDDEN), jnp.float32))
        wi.append(_normal(next(ks), (HIDDEN, INTERMEDIATE)))
        bi.append(jnp.zeros((1, INTERMEDIATE), jnp.float32))
        wf.append(_normal(next(ks), (INTERMEDIATE, HIDDEN)))
        bf.append(jnp.zeros((1, HIDDEN), jnp.float32))
        g2.append(jnp.ones((1, HIDDEN), jnp.float32))
        b2.append(jnp.zeros((1, HIDDEN), jnp.float32))

    stk = lambda xs: jnp.stack(xs, axis=0)
    return {
        "word_emb": word_emb, "pos_emb": pos_emb, "type_emb": type_emb,
        "emb_ln_g": jnp.ones((1, HIDDEN), jnp.float32),
        "emb_ln_b": jnp.zeros((1, HIDDEN), jnp.float32),
        "wqkv": stk(wqkv), "bqkv": stk(bqkv),
        "wo": stk(wo), "bo": stk(bo), "ln1_g": stk(g1), "ln1_b": stk(b1),
        "wi": stk(wi), "bi": stk(bi), "wf": stk(wf), "bf": stk(bf),
        "ln2_g": stk(g2), "ln2_b": stk(b2),
    }


# ------------------------------ forward pass ---------------------------------
def encoder_forward(params, src):
    """src: (B, S) int32 token ids -> last_hidden_state (B, S, H) f32."""
    B, S = src.shape

    # RoBERTa position ids: padding_idx + cumsum(mask) for non-pad tokens,
    # clamped against the position table size.
    tok_mask = src != PAD_IDX
    mask_i = tok_mask.astype(jnp.int32)
    position_ids = jnp.cumsum(mask_i, axis=1) * mask_i + PAD_IDX
    position_ids = jnp.minimum(position_ids, MAX_POS - 1)

    # Embedding gathers stay in XLA (glue; gather is not the hot path here).
    emb = (jnp.take(params["word_emb"], src, axis=0)
           + jnp.take(params["pos_emb"], position_ids, axis=0)
           + params["type_emb"][None, None, :]).astype(jnp.float32)

    # Additive attention mask over key columns: 0 for real tokens, -inf for pad.
    attn_bias = jnp.where(tok_mask, 0.0, NEG_INF).astype(jnp.float32)
    attn_bias = attn_bias.reshape(B, 1, S)

    weight_args = (params["emb_ln_g"], params["emb_ln_b"],
                   params["wqkv"], params["bqkv"],
                   params["wo"], params["bo"],
                   params["ln1_g"], params["ln1_b"],
                   params["wi"], params["bi"],
                   params["wf"], params["bf"],
                   params["ln2_g"], params["ln2_b"])

    in_specs = ([pl.BlockSpec((1, S, HIDDEN), lambda b: (b, 0, 0)),
                 pl.BlockSpec((1, 1, S), lambda b: (b, 0, 0))]
                + [_resident_spec(w) for w in weight_args])

    return pl.pallas_call(
        _encoder_kernel,
        out_shape=jax.ShapeDtypeStruct((B, S, HIDDEN), jnp.float32),
        grid=(B,),
        in_specs=in_specs,
        out_specs=pl.BlockSpec((1, S, HIDDEN), lambda b: (b, 0, 0)),
        scratch_shapes=[pltpu.VMEM((S, HIDDEN), jnp.float32)],
        compiler_params=pltpu.CompilerParams(
            dimension_semantics=("parallel",)),   # shards batch over v7x's 2 TCs
    )(emb, attn_bias, *weight_args)


# ---------------------------------- main -------------------------------------
if __name__ == "__main__":
    params = init_params(seed=0)

    key = jax.random.PRNGKey(0)
    # token ids in [2, VOCAB): avoid the padding index so all positions are real
    src = jax.random.randint(key, (BATCH, SEQ), minval=2, maxval=VOCAB,
                             dtype=jnp.int32)

    out = jax.jit(encoder_forward)(params, src)
    out = jax.block_until_ready(out)

    assert out.shape == (BATCH, SEQ, HIDDEN)
    assert out.dtype == jnp.float32
    assert bool(jnp.all(jnp.isfinite(out)))
    print("KERNEL_OK")
</pallas_src>

<mosaic_0001>
module attributes {stable_mosaic.version = 11 : i64} {
  func.func @_encoder_kernel(%arg0: i32, %arg1: memref<1x8x32xf32, #tpu.memory_space<vmem>>, %arg2: memref<1x1x8xf32, #tpu.memory_space<vmem>>, %arg3: memref<1x32xf32, #tpu.memory_space<vmem>>, %arg4: memref<1x32xf32, #tpu.memory_space<vmem>>, %arg5: memref<2x32x96xf32, #tpu.memory_space<vmem>>, %arg6: memref<2x1x96xf32, #tpu.memory_space<vmem>>, %arg7: memref<2x32x32xf32, #tpu.memory_space<vmem>>, %arg8: memref<2x1x32xf32, #tpu.memory_space<vmem>>, %arg9: memref<2x1x32xf32, #tpu.memory_space<vmem>>, %arg10: memref<2x1x32xf32, #tpu.memory_space<vmem>>, %arg11: memref<2x32x64xf32, #tpu.memory_space<vmem>>, %arg12: memref<2x1x64xf32, #tpu.memory_space<vmem>>, %arg13: memref<2x64x32xf32, #tpu.memory_space<vmem>>, %arg14: memref<2x1x32xf32, #tpu.memory_space<vmem>>, %arg15: memref<2x1x32xf32, #tpu.memory_space<vmem>>, %arg16: memref<2x1x32xf32, #tpu.memory_space<vmem>>, %arg17: memref<1x8x32xf32, #tpu.memory_space<vmem>>, %arg18: memref<8x32xf32, #tpu.memory_space<vmem>>) attributes {dimension_semantics = [#tpu.dimension_semantics<parallel>], iteration_bounds = array<i64: 2>, scalar_prefetch = 0 : i64, scratch_operands = 1 : i64, tpu.core_type = #tpu.core_type<tc>, window_params = [{transform_indices = @transform_0, window_bounds = array<i64: 1, 8, 32>}, {transform_indices = @transform_1, window_bounds = array<i64: 1, 1, 8>}, {pipeline_mode = #tpu.pipeline_mode<synchronous>, transform_indices = @transform_2, window_bounds = array<i64: 1, 32>}, {pipeline_mode = #tpu.pipeline_mode<synchronous>, transform_indices = @transform_3, window_bounds = array<i64: 1, 32>}, {pipeline_mode = #tpu.pipeline_mode<synchronous>, transform_indices = @transform_4, window_bounds = array<i64: 2, 32, 96>}, {pipeline_mode = #tpu.pipeline_mode<synchronous>, transform_indices = @transform_5, window_bounds = array<i64: 2, 1, 96>}, {pipeline_mode = #tpu.pipeline_mode<synchronous>, transform_indices = @transform_6, window_bounds = array<i64: 2, 32, 32>}, {pipeline_mode = #tpu.pipeline_mode<synchronous>, transform_indices = @transform_7, window_bounds = array<i64: 2, 1, 32>}, {pipeline_mode = #tpu.pipeline_mode<synchronous>, transform_indices = @transform_8, window_bounds = array<i64: 2, 1, 32>}, {pipeline_mode = #tpu.pipeline_mode<synchronous>, transform_indices = @transform_9, window_bounds = array<i64: 2, 1, 32>}, {pipeline_mode = #tpu.pipeline_mode<synchronous>, transform_indices = @transform_10, window_bounds = array<i64: 2, 32, 64>}, {pipeline_mode = #tpu.pipeline_mode<synchronous>, transform_indices = @transform_11, window_bounds = array<i64: 2, 1, 64>}, {pipeline_mode = #tpu.pipeline_mode<synchronous>, transform_indices = @transform_12, window_bounds = array<i64: 2, 64, 32>}, {pipeline_mode = #tpu.pipeline_mode<synchronous>, transform_indices = @transform_13, window_bounds = array<i64: 2, 1, 32>}, {pipeline_mode = #tpu.pipeline_mode<synchronous>, transform_indices = @transform_14, window_bounds = array<i64: 2, 1, 32>}, {pipeline_mode = #tpu.pipeline_mode<synchronous>, transform_indices = @transform_15, window_bounds = array<i64: 2, 1, 32>}, {transform_indices = @transform_16, window_bounds = array<i64: 1, 8, 32>}]} {
    %c0 = arith.constant 0 : index
    %c0_0 = arith.constant 0 : index
    %c0_1 = arith.constant 0 : index
    %0 = vector.load %arg2[%c0, %c0_0, %c0_1] : memref<1x1x8xf32, #tpu.memory_space<vmem>>, vector<1x1x8xf32>
    %1 = vector.shape_cast %0 : vector<1x1x8xf32> to vector<1x8xf32>
    %c0_2 = arith.constant 0 : index
    %c0_3 = arith.constant 0 : index
    %c0_4 = arith.constant 0 : index
    %2 = vector.load %arg1[%c0_2, %c0_3, %c0_4] : memref<1x8x32xf32, #tpu.memory_space<vmem>>, vector<1x8x32xf32>
    %3 = vector.shape_cast %2 : vector<1x8x32xf32> to vector<8x32xf32>
    %c0_5 = arith.constant 0 : index
    %c0_6 = arith.constant 0 : index
    %4 = vector.load %arg3[%c0_5, %c0_6] : memref<1x32xf32, #tpu.memory_space<vmem>>, vector<1x32xf32>
    %c0_7 = arith.constant 0 : index
    %c0_8 = arith.constant 0 : index
    %5 = vector.load %arg4[%c0_7, %c0_8] : memref<1x32xf32, #tpu.memory_space<vmem>>, vector<1x32xf32>
    %cst = arith.constant dense<0.000000e+00> : vector<8xf32>
    %6 = vector.multi_reduction <add>, %3, %cst [1] : vector<8x32xf32> to vector<8xf32>
    %7 = vector.shape_cast %6 : vector<8xf32> to vector<8x1xf32>
    %cst_9 = arith.constant 3.200000e+01 : f32
    %8 = vector.broadcast %cst_9 : f32 to vector<8x1xf32>
    %9 = arith.divf %7, %8 : vector<8x1xf32>
    %10 = vector.broadcast %9 : vector<8x1xf32> to vector<8x32xf32>
    %11 = arith.subf %3, %10 : vector<8x32xf32>
    %12 = arith.mulf %11, %11 : vector<8x32xf32>
    %cst_10 = arith.constant dense<0.000000e+00> : vector<8xf32>
    %13 = vector.multi_reduction <add>, %12, %cst_10 [1] : vector<8x32xf32> to vector<8xf32>
    %14 = vector.shape_cast %13 : vector<8xf32> to vector<8x1xf32>
    %cst_11 = arith.constant 3.200000e+01 : f32
    %15 = vector.broadcast %cst_11 : f32 to vector<8x1xf32>
    %16 = arith.divf %14, %15 : vector<8x1xf32>
    %cst_12 = arith.constant 9.99999974E-6 : f32
    %17 = vector.broadcast %cst_12 : f32 to vector<8x1xf32>
    %18 = arith.addf %16, %17 : vector<8x1xf32>
    %19 = math.rsqrt %18 : vector<8x1xf32>
    %20 = vector.broadcast %19 : vector<8x1xf32> to vector<8x32xf32>
    %21 = arith.mulf %11, %20 : vector<8x32xf32>
    %22 = vector.broadcast %4 : vector<1x32xf32> to vector<8x32xf32>
    %23 = arith.mulf %21, %22 : vector<8x32xf32>
    %24 = vector.broadcast %5 : vector<1x32xf32> to vector<8x32xf32>
    %25 = arith.addf %23, %24 : vector<8x32xf32>
    %c0_13 = arith.constant 0 : index
    %c0_14 = arith.constant 0 : index
    %c0_15 = arith.constant 0 : index
    %26 = vector.load %arg5[%c0_13, %c0_14, %c0_15] : memref<2x32x96xf32, #tpu.memory_space<vmem>>, vector<1x32x96xf32>
    %27 = vector.shape_cast %26 : vector<1x32x96xf32> to vector<32x96xf32>
    %cst_16 = arith.constant dense<0.000000e+00> : vector<8x96xf32>
    %28 = tpu.matmul %25, %27, %cst_16 {dimension_numbers = #tpu.dot_dimension_numbers<[1], [0], [0], [1], [0, 0, 1, 1], [], []>} : vector<8x32xf32>, vector<32x96xf32>, vector<8x96xf32> -> vector<8x96xf32>
    %c0_17 = arith.constant 0 : index
    %c0_18 = arith.constant 0 : index
    %c0_19 = arith.constant 0 : index
    %29 = vector.load %arg6[%c0_17, %c0_18, %c0_19] : memref<2x1x96xf32, #tpu.memory_space<vmem>>, vector<1x1x96xf32>
    %30 = vector.shape_cast %29 : vector<1x1x96xf32> to vector<1x96xf32>
    %31 = vector.broadcast %30 : vector<1x96xf32> to vector<8x96xf32>
    %32 = arith.addf %28, %31 : vector<8x96xf32>
    %33 = vector.extract_strided_slice %32 {offsets = [0, 0], sizes = [8, 32], strides = [1, 1]} : vector<8x96xf32> to vector<8x32xf32>
    %34 = vector.extract_strided_slice %32 {offsets = [0, 32], sizes = [8, 32], strides = [1, 1]} : vector<8x96xf32> to vector<8x32xf32>
    %35 = vector.extract_strided_slice %32 {offsets = [0, 64], sizes = [8, 32], strides = [1, 1]} : vector<8x96xf32> to vector<8x32xf32>
    %36 = vector.extract_strided_slice %33 {offsets = [0, 0], sizes = [8, 8], strides = [1, 1]} : vector<8x32xf32> to vector<8x8xf32>
    %37 = vector.extract_strided_slice %34 {offsets = [0, 0], sizes = [8, 8], strides = [1, 1]} : vector<8x32xf32> to vector<8x8xf32>
    %38 = vector.extract_strided_slice %35 {offsets = [0, 0], sizes = [8, 8], strides = [1, 1]} : vector<8x32xf32> to vector<8x8xf32>
    %cst_20 = arith.constant dense<0.000000e+00> : vector<8x8xf32>
    %39 = tpu.matmul %36, %37, %cst_20 {dimension_numbers = #tpu.dot_dimension_numbers<[1], [1], [0], [0], [0, 0, 1, 0], [], []>} : vector<8x8xf32>, vector<8x8xf32>, vector<8x8xf32> -> vector<8x8xf32>
    %cst_21 = arith.constant 0.353553385 : f32
    %40 = vector.broadcast %cst_21 : f32 to vector<8x8xf32>
    %41 = arith.mulf %39, %40 : vector<8x8xf32>
    %42 = vector.broadcast %1 : vector<1x8xf32> to vector<8x8xf32>
    %43 = arith.addf %41, %42 : vector<8x8xf32>
    %cst_22 = arith.constant dense<0xFF800000> : vector<8xf32>
    %44 = vector.multi_reduction <maximumf>, %43, %cst_22 [1] : vector<8x8xf32> to vector<8xf32>
    %45 = vector.shape_cast %44 : vector<8xf32> to vector<8x1xf32>
    %46 = vector.broadcast %45 : vector<8x1xf32> to vector<8x8xf32>
    %47 = arith.subf %43, %46 : vector<8x8xf32>
    %48 = math.exp %47 : vector<8x8xf32>
    %cst_23 = arith.constant dense<0.000000e+00> : vector<8xf32>
    %49 = vector.multi_reduction <add>, %48, %cst_23 [1] : vector<8x8xf32> to vector<8xf32>
    %50 = vector.shape_cast %49 : vector<8xf32> to vector<8x1xf32>
    %51 = tpu.reciprocal %50 {approx = true} : vector<8x1xf32> -> vector<8x1xf32>
    %52 = vector.broadcast %51 : vector<8x1xf32> to vector<8x8xf32>
    %53 = arith.mulf %48, %52 : vector<8x8xf32>
    %cst_24 = arith.constant dense<0.000000e+00> : vector<8x8xf32>
    %54 = tpu.matmul %53, %38, %cst_24 {dimension_numbers = #tpu.dot_dimension_numbers<[1], [0], [0], [1], [0, 0, 1, 1], [], []>} : vector<8x8xf32>, vector<8x8xf32>, vector<8x8xf32> -> vector<8x8xf32>
    %c0_25 = arith.constant 0 : index
    %c0_26 = arith.constant 0 : index
    %55 = vector.load %arg18[%c0_25, %c0_26] : memref<8x32xf32, #tpu.memory_space<vmem>>, vector<8x8xf32>
    tpu.vector_store %arg18[%c0_25, %c0_26], %54 {strides = array<i32>} : memref<8x32xf32, #tpu.memory_space<vmem>>, vector<8x8xf32>,
    %56 = vector.extract_strided_slice %33 {offsets = [0, 8], sizes = [8, 8], strides = [1, 1]} : vector<8x32xf32> to vector<8x8xf32>
    %57 = vector.extract_strided_slice %34 {offsets = [0, 8], sizes = [8, 8], strides = [1, 1]} : vector<8x32xf32> to vector<8x8xf32>
    %58 = vector.extract_strided_slice %35 {offsets = [0, 8], sizes = [8, 8], strides = [1, 1]} : vector<8x32xf32> to vector<8x8xf32>
    %cst_27 = arith.constant dense<0.000000e+00> : vector<8x8xf32>
    %59 = tpu.matmul %56, %57, %cst_27 {dimension_numbers = #tpu.dot_dimension_numbers<[1], [1], [0], [0], [0, 0, 1, 0], [], []>} : vector<8x8xf32>, vector<8x8xf32>, vector<8x8xf32> -> vector<8x8xf32>
    %cst_28 = arith.constant 0.353553385 : f32
    %60 = vector.broadcast %cst_28 : f32 to vector<8x8xf32>
    %61 = arith.mulf %59, %60 : vector<8x8xf32>
    %62 = vector.broadcast %1 : vector<1x8xf32> to vector<8x8xf32>
    %63 = arith.addf %61, %62 : vector<8x8xf32>
    %cst_29 = arith.constant dense<0xFF800000> : vector<8xf32>
    %64 = vector.multi_reduction <maximumf>, %63, %cst_29 [1] : vector<8x8xf32> to vector<8xf32>
    %65 = vector.shape_cast %64 : vector<8xf32> to vector<8x1xf32>
    %66 = vector.broadcast %65 : vector<8x1xf32> to vector<8x8xf32>
    %67 = arith.subf %63, %66 : vector<8x8xf32>
    %68 = math.exp %67 : vector<8x8xf32>
    %cst_30 = arith.constant dense<0.000000e+00> : vector<8xf32>
    %69 = vector.multi_reduction <add>, %68, %cst_30 [1] : vector<8x8xf32> to vector<8xf32>
    %70 = vector.shape_cast %69 : vector<8xf32> to vector<8x1xf32>
    %71 = tpu.reciprocal %70 {approx = true} : vector<8x1xf32> -> vector<8x1xf32>
    %72 = vector.broadcast %71 : vector<8x1xf32> to vector<8x8xf32>
    %73 = arith.mulf %68, %72 : vector<8x8xf32>
    %cst_31 = arith.constant dense<0.000000e+00> : vector<8x8xf32>
    %74 = tpu.matmul %73, %58, %cst_31 {dimension_numbers = #tpu.dot_dimension_numbers<[1], [0], [0], [1], [0, 0, 1, 1], [], []>} : vector<8x8xf32>, vector<8x8xf32>, vector<8x8xf32> -> vector<8x8xf32>
    %c0_32 = arith.constant 0 : index
    %c8 = arith.constant 8 : index
    %75 = vector.load %arg18[%c0_32, %c8] : memref<8x32xf32, #tpu.memory_space<vmem>>, vector<8x8xf32>
    tpu.vector_store %arg18[%c0_32, %c8], %74 {strides = array<i32>} : memref<8x32xf32, #tpu.memory_space<vmem>>, vector<8x8xf32>,
    %76 = vector.extract_strided_slice %33 {offsets = [0, 16], sizes = [8, 8], strides = [1, 1]} : vector<8x32xf32> to vector<8x8xf32>
    %77 = vector.extract_strided_slice %34 {offsets = [0, 16], sizes = [8, 8], strides = [1, 1]} : vector<8x32xf32> to vector<8x8xf32>
    %78 = vector.extract_strided_slice %35 {offsets = [0, 16], sizes = [8, 8], strides = [1, 1]} : vector<8x32xf32> to vector<8x8xf32>
    %cst_33 = arith.constant dense<0.000000e+00> : vector<8x8xf32>
    %79 = tpu.matmul %76, %77, %cst_33 {dimension_numbers = #tpu.dot_dimension_numbers<[1], [1], [0], [0], [0, 0, 1, 0], [], []>} : vector<8x8xf32>, vector<8x8xf32>, vector<8x8xf32> -> vector<8x8xf32>
    %cst_34 = arith.constant 0.353553385 : f32
    %80 = vector.broadcast %cst_34 : f32 to vector<8x8xf32>
    %81 = arith.mulf %79, %80 : vector<8x8xf32>
    %82 = vector.broadcast %1 : vector<1x8xf32> to vector<8x8xf32>
    %83 = arith.addf %81, %82 : vector<8x8xf32>
    %cst_35 = arith.constant dense<0xFF800000> : vector<8xf32>
    %84 = vector.multi_reduction <maximumf>, %83, %cst_35 [1] : vector<8x8xf32> to vector<8xf32>
    %85 = vector.shape_cast %84 : vector<8xf32> to vector<8x1xf32>
    %86 = vector.broadcast %85 : vector<8x1xf32> to vector<8x8xf32>
    %87 = arith.subf %83, %86 : vector<8x8xf32>
    %88 = math.exp %87 : vector<8x8xf32>
    %cst_36 = arith.constant dense<0.000000e+00> : vector<8xf32>
    %89 = vector.multi_reduction <add>, %88, %cst_36 [1] : vector<8x8xf32> to vector<8xf32>
    %90 = vector.shape_cast %89 : vector<8xf32> to vector<8x1xf32>
    %91 = tpu.reciprocal %90 {approx = true} : vector<8x1xf32> -> vector<8x1xf32>
    %92 = vector.broadcast %91 : vector<8x1xf32> to vector<8x8xf32>
    %93 = arith.mulf %88, %92 : vector<8x8xf32>
    %cst_37 = arith.constant dense<0.000000e+00> : vector<8x8xf32>
    %94 = tpu.matmul %93, %78, %cst_37 {dimension_numbers = #tpu.dot_dimension_numbers<[1], [0], [0], [1], [0, 0, 1, 1], [], []>} : vector<8x8xf32>, vector<8x8xf32>, vector<8x8xf32> -> vector<8x8xf32>
    %c0_38 = arith.constant 0 : index
    %c16 = arith.constant 16 : index
    %95 = vector.load %arg18[%c0_38, %c16] : memref<8x32xf32, #tpu.memory_space<vmem>>, vector<8x8xf32>
    tpu.vector_store %arg18[%c0_38, %c16], %94 {strides = array<i32>} : memref<8x32xf32, #tpu.memory_space<vmem>>, vector<8x8xf32>,
    %96 = vector.extract_strided_slice %33 {offsets = [0, 24], sizes = [8, 8], strides = [1, 1]} : vector<8x32xf32> to vector<8x8xf32>
    %97 = vector.extract_strided_slice %34 {offsets = [0, 24], sizes = [8, 8], strides = [1, 1]} : vector<8x32xf32> to vector<8x8xf32>
    %98 = vector.extract_strided_slice %35 {offsets = [0, 24], sizes = [8, 8], strides = [1, 1]} : vector<8x32xf32> to vector<8x8xf32>
    %cst_39 = arith.constant dense<0.000000e+00> : vector<8x8xf32>
    %99 = tpu.matmul %96, %97, %cst_39 {dimension_numbers = #tpu.dot_dimension_numbers<[1], [1], [0], [0], [0, 0, 1, 0], [], []>} : vector<8x8xf32>, vector<8x8xf32>, vector<8x8xf32> -> vector<8x8xf32>
    %cst_40 = arith.constant 0.353553385 : f32
    %100 = vector.broadcast %cst_40 : f32 to vector<8x8xf32>
    %101 = arith.mulf %99, %100 : vector<8x8xf32>
    %102 = vector.broadcast %1 : vector<1x8xf32> to vector<8x8xf32>
    %103 = arith.addf %101, %102 : vector<8x8xf32>
    %cst_41 = arith.constant dense<0xFF800000> : vector<8xf32>
    %104 = vector.multi_reduction <maximumf>, %103, %cst_41 [1] : vector<8x8xf32> to vector<8xf32>
    %105 = vector.shape_cast %104 : vector<8xf32> to vector<8x1xf32>
    %106 = vector.broadcast %105 : vector<8x1xf32> to vector<8x8xf32>
    %107 = arith.subf %103, %106 : vector<8x8xf32>
    %108 = math.exp %107 : vector<8x8xf32>
    %cst_42 = arith.constant dense<0.000000e+00> : vector<8xf32>
    %109 = vector.multi_reduction <add>, %108, %cst_42 [1] : vector<8x8xf32> to vector<8xf32>
    %110 = vector.shape_cast %109 : vector<8xf32> to vector<8x1xf32>
    %111 = tpu.reciprocal %110 {approx = true} : vector<8x1xf32> -> vector<8x1xf32>
    %112 = vector.broadcast %111 : vector<8x1xf32> to vector<8x8xf32>
    %113 = arith.mulf %108, %112 : vector<8x8xf32>
    %cst_43 = arith.constant dense<0.000000e+00> : vector<8x8xf32>
    %114 = tpu.matmul %113, %98, %cst_43 {dimension_numbers = #tpu.dot_dimension_numbers<[1], [0], [0], [1], [0, 0, 1, 1], [], []>} : vector<8x8xf32>, vector<8x8xf32>, vector<8x8xf32> -> vector<8x8xf32>
    %c0_44 = arith.constant 0 : index
    %c24 = arith.constant 24 : index
    %115 = vector.load %arg18[%c0_44, %c24] : memref<8x32xf32, #tpu.memory_space<vmem>>, vector<8x8xf32>
    tpu.vector_store %arg18[%c0_44, %c24], %114 {strides = array<i32>} : memref<8x32xf32, #tpu.memory_space<vmem>>, vector<8x8xf32>,
    %c0_45 = arith.constant 0 : index
    %c0_46 = arith.constant 0 : index
    %116 = vector.load %arg18[%c0_45, %c0_46] : memref<8x32xf32, #tpu.memory_space<vmem>>, vector<8x32xf32>
    %c0_47 = arith.constant 0 : index
    %c0_48 = arith.constant 0 : index
    %c0_49 = arith.constant 0 : index
    %117 = vector.load %arg7[%c0_47, %c0_48, %c0_49] : memref<2x32x32xf32, #tpu.memory_space<vmem>>, vector<1x32x32xf32>
    %118 = vector.shape_cast %117 : vector<1x32x32xf32> to vector<32x32xf32>
    %cst_50 = arith.constant dense<0.000000e+00> : vector<8x32xf32>
    %119 = tpu.matmul %116, %118, %cst_50 {dimension_numbers = #tpu.dot_dimension_numbers<[1], [0], [0], [1], [0, 0, 1, 1], [], []>} : vector<8x32xf32>, vector<32x32xf32>, vector<8x32xf32> -> vector<8x32xf32>
    %c0_51 = arith.constant 0 : index
    %c0_52 = arith.constant 0 : index
    %c0_53 = arith.constant 0 : index
    %120 = vector.load %arg8[%c0_51, %c0_52, %c0_53] : memref<2x1x32xf32, #tpu.memory_space<vmem>>, vector<1x1x32xf32>
    %121 = vector.shape_cast %120 : vector<1x1x32xf32> to vector<1x32xf32>
    %122 = vector.broadcast %121 : vector<1x32xf32> to vector<8x32xf32>
    %123 = arith.addf %119, %122 : vector<8x32xf32>
    %124 = arith.addf %123, %25 : vector<8x32xf32>
    %c0_54 = arith.constant 0 : index
    %c0_55 = arith.constant 0 : index
    %c0_56 = arith.constant 0 : index
    %125 = vector.load %arg9[%c0_54, %c0_55, %c0_56] : memref<2x1x32xf32, #tpu.memory_space<vmem>>, vector<1x1x32xf32>
    %126 = vector.shape_cast %125 : vector<1x1x32xf32> to vector<1x32xf32>
    %c0_57 = arith.constant 0 : index
    %c0_58 = arith.constant 0 : index
    %c0_59 = arith.constant 0 : index
    %127 = vector.load %arg10[%c0_57, %c0_58, %c0_59] : memref<2x1x32xf32, #tpu.memory_space<vmem>>, vector<1x1x32xf32>
    %128 = vector.shape_cast %127 : vector<1x1x32xf32> to vector<1x32xf32>
    %cst_60 = arith.constant dense<0.000000e+00> : vector<8xf32>
    %129 = vector.multi_reduction <add>, %124, %cst_60 [1] : vector<8x32xf32> to vector<8xf32>
    %130 = vector.shape_cast %129 : vector<8xf32> to vector<8x1xf32>
    %cst_61 = arith.constant 3.200000e+01 : f32
    %131 = vector.broadcast %cst_61 : f32 to vector<8x1xf32>
    %132 = arith.divf %130, %131 : vector<8x1xf32>
    %133 = vector.broadcast %132 : vector<8x1xf32> to vector<8x32xf32>
    %134 = arith.subf %124, %133 : vector<8x32xf32>
    %135 = arith.mulf %134, %134 : vector<8x32xf32>
    %cst_62 = arith.constant dense<0.000000e+00> : vector<8xf32>
    %136 = vector.multi_reduction <add>, %135, %cst_62 [1] : vector<8x32xf32> to vector<8xf32>
    %137 = vector.shape_cast %136 : vector<8xf32> to vector<8x1xf32>
    %cst_63 = arith.constant 3.200000e+01 : f32
    %138 = vector.broadcast %cst_63 : f32 to vector<8x1xf32>
    %139 = arith.divf %137, %138 : vector<8x1xf32>
    %cst_64 = arith.constant 9.99999974E-6 : f32
    %140 = vector.broadcast %cst_64 : f32 to vector<8x1xf32>
    %141 = arith.addf %139, %140 : vector<8x1xf32>
    %142 = math.rsqrt %141 : vector<8x1xf32>
    %143 = vector.broadcast %142 : vector<8x1xf32> to vector<8x32xf32>
    %144 = arith.mulf %134, %143 : vector<8x32xf32>
    %145 = vector.broadcast %126 : vector<1x32xf32> to vector<8x32xf32>
    %146 = arith.mulf %144, %145 : vector<8x32xf32>
    %147 = vector.broadcast %128 : vector<1x32xf32> to vector<8x32xf32>
    %148 = arith.addf %146, %147 : vector<8x32xf32>
    %c0_65 = arith.constant 0 : index
    %c0_66 = arith.constant 0 : index
    %c0_67 = arith.constant 0 : index
    %149 = vector.load %arg11[%c0_65, %c0_66, %c0_67] : memref<2x32x64xf32, #tpu.memory_space<vmem>>, vector<1x32x64xf32>
    %150 = vector.shape_cast %149 : vector<1x32x64xf32> to vector<32x64xf32>
    %cst_68 = arith.constant dense<0.000000e+00> : vector<8x64xf32>
    %151 = tpu.matmul %148, %150, %cst_68 {dimension_numbers = #tpu.dot_dimension_numbers<[1], [0], [0], [1], [0, 0, 1, 1], [], []>} : vector<8x32xf32>, vector<32x64xf32>, vector<8x64xf32> -> vector<8x64xf32>
    %c0_69 = arith.constant 0 : index
    %c0_70 = arith.constant 0 : index
    %c0_71 = arith.constant 0 : index
    %152 = vector.load %arg12[%c0_69, %c0_70, %c0_71] : memref<2x1x64xf32, #tpu.memory_space<vmem>>, vector<1x1x64xf32>
    %153 = vector.shape_cast %152 : vector<1x1x64xf32> to vector<1x64xf32>
    %154 = vector.broadcast %153 : vector<1x64xf32> to vector<8x64xf32>
    %155 = arith.addf %151, %154 : vector<8x64xf32>
    %cst_72 = arith.constant 5.000000e-01 : f32
    %156 = vector.broadcast %cst_72 : f32 to vector<8x64xf32>
    %157 = arith.mulf %156, %155 : vector<8x64xf32>
    %cst_73 = arith.constant 0.707106769 : f32
    %158 = vector.broadcast %cst_73 : f32 to vector<8x64xf32>
    %159 = arith.mulf %155, %158 : vector<8x64xf32>
    %160 = math.erf %159 : vector<8x64xf32>
    %cst_74 = arith.constant 1.000000e+00 : f32
    %161 = vector.broadcast %cst_74 : f32 to vector<8x64xf32>
    %162 = arith.addf %161, %160 : vector<8x64xf32>
    %163 = arith.mulf %157, %162 : vector<8x64xf32>
    %c0_75 = arith.constant 0 : index
    %c0_76 = arith.constant 0 : index
    %c0_77 = arith.constant 0 : index
    %164 = vector.load %arg13[%c0_75, %c0_76, %c0_77] : memref<2x64x32xf32, #tpu.memory_space<vmem>>, vector<1x64x32xf32>
    %165 = vector.shape_cast %164 : vector<1x64x32xf32> to vector<64x32xf32>
    %cst_78 = arith.constant dense<0.000000e+00> : vector<8x32xf32>
    %166 = tpu.matmul %163, %165, %cst_78 {dimension_numbers = #tpu.dot_dimension_numbers<[1], [0], [0], [1], [0, 0, 1, 1], [], []>} : vector<8x64xf32>, vector<64x32xf32>, vector<8x32xf32> -> vector<8x32xf32>
    %c0_79 = arith.constant 0 : index
    %c0_80 = arith.constant 0 : index
    %c0_81 = arith.constant 0 : index
    %167 = vector.load %arg14[%c0_79, %c0_80, %c0_81] : memref<2x1x32xf32, #tpu.memory_space<vmem>>, vector<1x1x32xf32>
    %168 = vector.shape_cast %167 : vector<1x1x32xf32> to vector<1x32xf32>
    %169 = vector.broadcast %168 : vector<1x32xf32> to vector<8x32xf32>
    %170 = arith.addf %166, %169 : vector<8x32xf32>
    %171 = arith.addf %170, %148 : vector<8x32xf32>
    %c0_82 = arith.constant 0 : index
    %c0_83 = arith.constant 0 : index
    %c0_84 = arith.constant 0 : index
    %172 = vector.load %arg15[%c0_82, %c0_83, %c0_84] : memref<2x1x32xf32, #tpu.memory_space<vmem>>, vector<1x1x32xf32>
    %173 = vector.shape_cast %172 : vector<1x1x32xf32> to vector<1x32xf32>
    %c0_85 = arith.constant 0 : index
    %c0_86 = arith.constant 0 : index
    %c0_87 = arith.constant 0 : index
    %174 = vector.load %arg16[%c0_85, %c0_86, %c0_87] : memref<2x1x32xf32, #tpu.memory_space<vmem>>, vector<1x1x32xf32>
    %175 = vector.shape_cast %174 : vector<1x1x32xf32> to vector<1x32xf32>
    %cst_88 = arith.constant dense<0.000000e+00> : vector<8xf32>
    %176 = vector.multi_reduction <add>, %171, %cst_88 [1] : vector<8x32xf32> to vector<8xf32>
    %177 = vector.shape_cast %176 : vector<8xf32> to vector<8x1xf32>
    %cst_89 = arith.constant 3.200000e+01 : f32
    %178 = vector.broadcast %cst_89 : f32 to vector<8x1xf32>
    %179 = arith.divf %177, %178 : vector<8x1xf32>
    %180 = vector.broadcast %179 : vector<8x1xf32> to vector<8x32xf32>
    %181 = arith.subf %171, %180 : vector<8x32xf32>
    %182 = arith.mulf %181, %181 : vector<8x32xf32>
    %cst_90 = arith.constant dense<0.000000e+00> : vector<8xf32>
    %183 = vector.multi_reduction <add>, %182, %cst_90 [1] : vector<8x32xf32> to vector<8xf32>
    %184 = vector.shape_cast %183 : vector<8xf32> to vector<8x1xf32>
    %cst_91 = arith.constant 3.200000e+01 : f32
    %185 = vector.broadcast %cst_91 : f32 to vector<8x1xf32>
    %186 = arith.divf %184, %185 : vector<8x1xf32>
    %cst_92 = arith.constant 9.99999974E-6 : f32
    %187 = vector.broadcast %cst_92 : f32 to vector<8x1xf32>
    %188 = arith.addf %186, %187 : vector<8x1xf32>
    %189 = math.rsqrt %188 : vector<8x1xf32>
    %190 = vector.broadcast %189 : vector<8x1xf32> to vector<8x32xf32>
    %191 = arith.mulf %181, %190 : vector<8x32xf32>
    %192 = vector.broadcast %173 : vector<1x32xf32> to vector<8x32xf32>
    %193 = arith.mulf %191, %192 : vector<8x32xf32>
    %194 = vector.broadcast %175 : vector<1x32xf32> to vector<8x32xf32>
    %195 = arith.addf %193, %194 : vector<8x32xf32>
    %c1 = arith.constant 1 : index
    %c0_93 = arith.constant 0 : index
    %c0_94 = arith.constant 0 : index
    %196 = vector.load %arg5[%c1, %c0_93, %c0_94] : memref<2x32x96xf32, #tpu.memory_space<vmem>>, vector<1x32x96xf32>
    %197 = vector.shape_cast %196 : vector<1x32x96xf32> to vector<32x96xf32>
    %cst_95 = arith.constant dense<0.000000e+00> : vector<8x96xf32>
    %198 = tpu.matmul %195, %197, %cst_95 {dimension_numbers = #tpu.dot_dimension_numbers<[1], [0], [0], [1], [0, 0, 1, 1], [], []>} : vector<8x32xf32>, vector<32x96xf32>, vector<8x96xf32> -> vector<8x96xf32>
    %c1_96 = arith.constant 1 : index
    %c0_97 = arith.constant 0 : index
    %c0_98 = arith.constant 0 : index
    %199 = vector.load %arg6[%c1_96, %c0_97, %c0_98] : memref<2x1x96xf32, #tpu.memory_space<vmem>>, vector<1x1x96xf32>
    %200 = vector.shape_cast %199 : vector<1x1x96xf32> to vector<1x96xf32>
    %201 = vector.broadcast %200 : vector<1x96xf32> to vector<8x96xf32>
    %202 = arith.addf %198, %201 : vector<8x96xf32>
    %203 = vector.extract_strided_slice %202 {offsets = [0, 0], sizes = [8, 32], strides = [1, 1]} : vector<8x96xf32> to vector<8x32xf32>
    %204 = vector.extract_strided_slice %202 {offsets = [0, 32], sizes = [8, 32], strides = [1, 1]} : vector<8x96xf32> to vector<8x32xf32>
    %205 = vector.extract_strided_slice %202 {offsets = [0, 64], sizes = [8, 32], strides = [1, 1]} : vector<8x96xf32> to vector<8x32xf32>
    %206 = vector.extract_strided_slice %203 {offsets = [0, 0], sizes = [8, 8], strides = [1, 1]} : vector<8x32xf32> to vector<8x8xf32>
    %207 = vector.extract_strided_slice %204 {offsets = [0, 0], sizes = [8, 8], strides = [1, 1]} : vector<8x32xf32> to vector<8x8xf32>
    %208 = vector.extract_strided_slice %205 {offsets = [0, 0], sizes = [8, 8], strides = [1, 1]} : vector<8x32xf32> to vector<8x8xf32>
    %cst_99 = arith.constant dense<0.000000e+00> : vector<8x8xf32>
    %209 = tpu.matmul %206, %207, %cst_99 {dimension_numbers = #tpu.dot_dimension_numbers<[1], [1], [0], [0], [0, 0, 1, 0], [], []>} : vector<8x8xf32>, vector<8x8xf32>, vector<8x8xf32> -> vector<8x8xf32>
    %cst_100 = arith.constant 0.353553385 : f32
    %210 = vector.broadcast %cst_100 : f32 to vector<8x8xf32>
    %211 = arith.mulf %209, %210 : vector<8x8xf32>
    %212 = vector.broadcast %1 : vector<1x8xf32> to vector<8x8xf32>
    %213 = arith.addf %211, %212 : vector<8x8xf32>
    %cst_101 = arith.constant dense<0xFF800000> : vector<8xf32>
    %214 = vector.multi_reduction <maximumf>, %213, %cst_101 [1] : vector<8x8xf32> to vector<8xf32>
    %215 = vector.shape_cast %214 : vector<8xf32> to vector<8x1xf32>
    %216 = vector.broadcast %215 : vector<8x1xf32> to vector<8x8xf32>
    %217 = arith.subf %213, %216 : vector<8x8xf32>
    %218 = math.exp %217 : vector<8x8xf32>
    %cst_102 = arith.constant dense<0.000000e+00> : vector<8xf32>
    %219 = vector.multi_reduction <add>, %218, %cst_102 [1] : vector<8x8xf32> to vector<8xf32>
    %220 = vector.shape_cast %219 : vector<8xf32> to vector<8x1xf32>
    %221 = tpu.reciprocal %220 {approx = true} : vector<8x1xf32> -> vector<8x1xf32>
    %222 = vector.broadcast %221 : vector<8x1xf32> to vector<8x8xf32>
    %223 = arith.mulf %218, %222 : vector<8x8xf32>
    %cst_103 = arith.constant dense<0.000000e+00> : vector<8x8xf32>
    %224 = tpu.matmul %223, %208, %cst_103 {dimension_numbers = #tpu.dot_dimension_numbers<[1], [0], [0], [1], [0, 0, 1, 1], [], []>} : vector<8x8xf32>, vector<8x8xf32>, vector<8x8xf32> -> vector<8x8xf32>
    %c0_104 = arith.constant 0 : index
    %c0_105 = arith.constant 0 : index
    %225 = vector.load %arg18[%c0_104, %c0_105] : memref<8x32xf32, #tpu.memory_space<vmem>>, vector<8x8xf32>
    tpu.vector_store %arg18[%c0_104, %c0_105], %224 {strides = array<i32>} : memref<8x32xf32, #tpu.memory_space<vmem>>, vector<8x8xf32>,
    %226 = vector.extract_strided_slice %203 {offsets = [0, 8], sizes = [8, 8], strides = [1, 1]} : vector<8x32xf32> to vector<8x8xf32>
    %227 = vector.extract_strided_slice %204 {offsets = [0, 8], sizes = [8, 8], strides = [1, 1]} : vector<8x32xf32> to vector<8x8xf32>
    %228 = vector.extract_strided_slice %205 {offsets = [0, 8], sizes = [8, 8], strides = [1, 1]} : vector<8x32xf32> to vector<8x8xf32>
    %cst_106 = arith.constant dense<0.000000e+00> : vector<8x8xf32>
    %229 = tpu.matmul %226, %227, %cst_106 {dimension_numbers = #tpu.dot_dimension_numbers<[1], [1], [0], [0], [0, 0, 1, 0], [], []>} : vector<8x8xf32>, vector<8x8xf32>, vector<8x8xf32> -> vector<8x8xf32>
    %cst_107 = arith.constant 0.353553385 : f32
    %230 = vector.broadcast %cst_107 : f32 to vector<8x8xf32>
    %231 = arith.mulf %229, %230 : vector<8x8xf32>
    %232 = vector.broadcast %1 : vector<1x8xf32> to vector<8x8xf32>
    %233 = arith.addf %231, %232 : vector<8x8xf32>
    %cst_108 = arith.constant dense<0xFF800000> : vector<8xf32>
    %234 = vector.multi_reduction <maximumf>, %233, %cst_108 [1] : vector<8x8xf32> to vector<8xf32>
    %235 = vector.shape_cast %234 : vector<8xf32> to vector<8x1xf32>
    %236 = vector.broadcast %235 : vector<8x1xf32> to vector<8x8xf32>
    %237 = arith.subf %233, %236 : vector<8x8xf32>
    %238 = math.exp %237 : vector<8x8xf32>
    %cst_109 = arith.constant dense<0.000000e+00> : vector<8xf32>
    %239 = vector.multi_reduction <add>, %238, %cst_109 [1] : vector<8x8xf32> to vector<8xf32>
    %240 = vector.shape_cast %239 : vector<8xf32> to vector<8x1xf32>
    %241 = tpu.reciprocal %240 {approx = true} : vector<8x1xf32> -> vector<8x1xf32>
    %242 = vector.broadcast %241 : vector<8x1xf32> to vector<8x8xf32>
    %243 = arith.mulf %238, %242 : vector<8x8xf32>
    %cst_110 = arith.constant dense<0.000000e+00> : vector<8x8xf32>
    %244 = tpu.matmul %243, %228, %cst_110 {dimension_numbers = #tpu.dot_dimension_numbers<[1], [0], [0], [1], [0, 0, 1, 1], [], []>} : vector<8x8xf32>, vector<8x8xf32>, vector<8x8xf32> -> vector<8x8xf32>
    %c0_111 = arith.constant 0 : index
    %c8_112 = arith.constant 8 : index
    %245 = vector.load %arg18[%c0_111, %c8_112] : memref<8x32xf32, #tpu.memory_space<vmem>>, vector<8x8xf32>
    tpu.vector_store %arg18[%c0_111, %c8_112], %244 {strides = array<i32>} : memref<8x32xf32, #tpu.memory_space<vmem>>, vector<8x8xf32>,
    %246 = vector.extract_strided_slice %203 {offsets = [0, 16], sizes = [8, 8], strides = [1, 1]} : vector<8x32xf32> to vector<8x8xf32>
    %247 = vector.extract_strided_slice %204 {offsets = [0, 16], sizes = [8, 8], strides = [1, 1]} : vector<8x32xf32> to vector<8x8xf32>
    %248 = vector.extract_strided_slice %205 {offsets = [0, 16], sizes = [8, 8], strides = [1, 1]} : vector<8x32xf32> to vector<8x8xf32>
    %cst_113 = arith.constant dense<0.000000e+00> : vector<8x8xf32>
    %249 = tpu.matmul %246, %247, %cst_113 {dimension_numbers = #tpu.dot_dimension_numbers<[1], [1], [0], [0], [0, 0, 1, 0], [], []>} : vector<8x8xf32>, vector<8x8xf32>, vector<8x8xf32> -> vector<8x8xf32>
    %cst_114 = arith.constant 0.353553385 : f32
    %250 = vector.broadcast %cst_114 : f32 to vector<8x8xf32>
    %251 = arith.mulf %249, %250 : vector<8x8xf32>
    %252 = vector.broadcast %1 : vector<1x8xf32> to vector<8x8xf32>
    %253 = arith.addf %251, %252 : vector<8x8xf32>
    %cst_115 = arith.constant dense<0xFF800000> : vector<8xf32>
    %254 = vector.multi_reduction <maximumf>, %253, %cst_115 [1] : vector<8x8xf32> to vector<8xf32>
    %255 = vector.shape_cast %254 : vector<8xf32> to vector<8x1xf32>
    %256 = vector.broadcast %255 : vector<8x1xf32> to vector<8x8xf32>
    %257 = arith.subf %253, %256 : vector<8x8xf32>
    %258 = math.exp %257 : vector<8x8xf32>
    %cst_116 = arith.constant dense<0.000000e+00> : vector<8xf32>
    %259 = vector.multi_reduction <add>, %258, %cst_116 [1] : vector<8x8xf32> to vector<8xf32>
    %260 = vector.shape_cast %259 : vector<8xf32> to vector<8x1xf32>
    %261 = tpu.reciprocal %260 {approx = true} : vector<8x1xf32> -> vector<8x1xf32>
    %262 = vector.broadcast %261 : vector<8x1xf32> to vector<8x8xf32>
    %263 = arith.mulf %258, %262 : vector<8x8xf32>
    %cst_117 = arith.constant dense<0.000000e+00> : vector<8x8xf32>
    %264 = tpu.matmul %263, %248, %cst_117 {dimension_numbers = #tpu.dot_dimension_numbers<[1], [0], [0], [1], [0, 0, 1, 1], [], []>} : vector<8x8xf32>, vector<8x8xf32>, vector<8x8xf32> -> vector<8x8xf32>
    %c0_118 = arith.constant 0 : index
    %c16_119 = arith.constant 16 : index
    %265 = vector.load %arg18[%c0_118, %c16_119] : memref<8x32xf32, #tpu.memory_space<vmem>>, vector<8x8xf32>
    tpu.vector_store %arg18[%c0_118, %c16_119], %264 {strides = array<i32>} : memref<8x32xf32, #tpu.memory_space<vmem>>, vector<8x8xf32>,
    %266 = vector.extract_strided_slice %203 {offsets = [0, 24], sizes = [8, 8], strides = [1, 1]} : vector<8x32xf32> to vector<8x8xf32>
    %267 = vector.extract_strided_slice %204 {offsets = [0, 24], sizes = [8, 8], strides = [1, 1]} : vector<8x32xf32> to vector<8x8xf32>
    %268 = vector.extract_strided_slice %205 {offsets = [0, 24], sizes = [8, 8], strides = [1, 1]} : vector<8x32xf32> to vector<8x8xf32>
    %cst_120 = arith.constant dense<0.000000e+00> : vector<8x8xf32>
    %269 = tpu.matmul %266, %267, %cst_120 {dimension_numbers = #tpu.dot_dimension_numbers<[1], [1], [0], [0], [0, 0, 1, 0], [], []>} : vector<8x8xf32>, vector<8x8xf32>, vector<8x8xf32> -> vector<8x8xf32>
    %cst_121 = arith.constant 0.353553385 : f32
    %270 = vector.broadcast %cst_121 : f32 to vector<8x8xf32>
    %271 = arith.mulf %269, %270 : vector<8x8xf32>
    %272 = vector.broadcast %1 : vector<1x8xf32> to vector<8x8xf32>
    %273 = arith.addf %271, %272 : vector<8x8xf32>
    %cst_122 = arith.constant dense<0xFF800000> : vector<8xf32>
    %274 = vector.multi_reduction <maximumf>, %273, %cst_122 [1] : vector<8x8xf32> to vector<8xf32>
    %275 = vector.shape_cast %274 : vector<8xf32> to vector<8x1xf32>
    %276 = vector.broadcast %275 : vector<8x1xf32> to vector<8x8xf32>
    %277 = arith.subf %273, %276 : vector<8x8xf32>
    %278 = math.exp %277 : vector<8x8xf32>
    %cst_123 = arith.constant dense<0.000000e+00> : vector<8xf32>
    %279 = vector.multi_reduction <add>, %278, %cst_123 [1] : vector<8x8xf32> to vector<8xf32>
    %280 = vector.shape_cast %279 : vector<8xf32> to vector<8x1xf32>
    %281 = tpu.reciprocal %280 {approx = true} : vector<8x1xf32> -> vector<8x1xf32>
    %282 = vector.broadcast %281 : vector<8x1xf32> to vector<8x8xf32>
    %283 = arith.mulf %278, %282 : vector<8x8xf32>
    %cst_124 = arith.constant dense<0.000000e+00> : vector<8x8xf32>
    %284 = tpu.matmul %283, %268, %cst_124 {dimension_numbers = #tpu.dot_dimension_numbers<[1], [0], [0], [1], [0, 0, 1, 1], [], []>} : vector<8x8xf32>, vector<8x8xf32>, vector<8x8xf32> -> vector<8x8xf32>
    %c0_125 = arith.constant 0 : index
    %c24_126 = arith.constant 24 : index
    %285 = vector.load %arg18[%c0_125, %c24_126] : memref<8x32xf32, #tpu.memory_space<vmem>>, vector<8x8xf32>
    tpu.vector_store %arg18[%c0_125, %c24_126], %284 {strides = array<i32>} : memref<8x32xf32, #tpu.memory_space<vmem>>, vector<8x8xf32>,
    %c0_127 = arith.constant 0 : index
    %c0_128 = arith.constant 0 : index
    %286 = vector.load %arg18[%c0_127, %c0_128] : memref<8x32xf32, #tpu.memory_space<vmem>>, vector<8x32xf32>
    %c1_129 = arith.constant 1 : index
    %c0_130 = arith.constant 0 : index
    %c0_131 = arith.constant 0 : index
    %287 = vector.load %arg7[%c1_129, %c0_130, %c0_131] : memref<2x32x32xf32, #tpu.memory_space<vmem>>, vector<1x32x32xf32>
    %288 = vector.shape_cast %287 : vector<1x32x32xf32> to vector<32x32xf32>
    %cst_132 = arith.constant dense<0.000000e+00> : vector<8x32xf32>
    %289 = tpu.matmul %286, %288, %cst_132 {dimension_numbers = #tpu.dot_dimension_numbers<[1], [0], [0], [1], [0, 0, 1, 1], [], []>} : vector<8x32xf32>, vector<32x32xf32>, vector<8x32xf32> -> vector<8x32xf32>
    %c1_133 = arith.constant 1 : index
    %c0_134 = arith.constant 0 : index
    %c0_135 = arith.constant 0 : index
    %290 = vector.load %arg8[%c1_133, %c0_134, %c0_135] : memref<2x1x32xf32, #tpu.memory_space<vmem>>, vector<1x1x32xf32>
    %291 = vector.shape_cast %290 : vector<1x1x32xf32> to vector<1x32xf32>
    %292 = vector.broadcast %291 : vector<1x32xf32> to vector<8x32xf32>
    %293 = arith.addf %289, %292 : vector<8x32xf32>
    %294 = arith.addf %293, %195 : vector<8x32xf32>
    %c1_136 = arith.constant 1 : index
    %c0_137 = arith.constant 0 : index
    %c0_138 = arith.constant 0 : index
    %295 = vector.load %arg9[%c1_136, %c0_137, %c0_138] : memref<2x1x32xf32, #tpu.memory_space<vmem>>, vector<1x1x32xf32>
    %296 = vector.shape_cast %295 : vector<1x1x32xf32> to vector<1x32xf32>
    %c1_139 = arith.constant 1 : index
    %c0_140 = arith.constant 0 : index
    %c0_141 = arith.constant 0 : index
    %297 = vector.load %arg10[%c1_139, %c0_140, %c0_141] : memref<2x1x32xf32, #tpu.memory_space<vmem>>, vector<1x1x32xf32>
    %298 = vector.shape_cast %297 : vector<1x1x32xf32> to vector<1x32xf32>
    %cst_142 = arith.constant dense<0.000000e+00> : vector<8xf32>
    %299 = vector.multi_reduction <add>, %294, %cst_142 [1] : vector<8x32xf32> to vector<8xf32>
    %300 = vector.shape_cast %299 : vector<8xf32> to vector<8x1xf32>
    %cst_143 = arith.constant 3.200000e+01 : f32
    %301 = vector.broadcast %cst_143 : f32 to vector<8x1xf32>
    %302 = arith.divf %300, %301 : vector<8x1xf32>
    %303 = vector.broadcast %302 : vector<8x1xf32> to vector<8x32xf32>
    %304 = arith.subf %294, %303 : vector<8x32xf32>
    %305 = arith.mulf %304, %304 : vector<8x32xf32>
    %cst_144 = arith.constant dense<0.000000e+00> : vector<8xf32>
    %306 = vector.multi_reduction <add>, %305, %cst_144 [1] : vector<8x32xf32> to vector<8xf32>
    %307 = vector.shape_cast %306 : vector<8xf32> to vector<8x1xf32>
    %cst_145 = arith.constant 3.200000e+01 : f32
    %308 = vector.broadcast %cst_145 : f32 to vector<8x1xf32>
    %309 = arith.divf %307, %308 : vector<8x1xf32>
    %cst_146 = arith.constant 9.99999974E-6 : f32
    %310 = vector.broadcast %cst_146 : f32 to vector<8x1xf32>
    %311 = arith.addf %309, %310 : vector<8x1xf32>
    %312 = math.rsqrt %311 : vector<8x1xf32>
    %313 = vector.broadcast %312 : vector<8x1xf32> to vector<8x32xf32>
    %314 = arith.mulf %304, %313 : vector<8x32xf32>
    %315 = vector.broadcast %296 : vector<1x32xf32> to vector<8x32xf32>
    %316 = arith.mulf %314, %315 : vector<8x32xf32>
    %317 = vector.broadcast %298 : vector<1x32xf32> to vector<8x32xf32>
    %318 = arith.addf %316, %317 : vector<8x32xf32>
    %c1_147 = arith.constant 1 : index
    %c0_148 = arith.constant 0 : index
    %c0_149 = arith.constant 0 : index
    %319 = vector.load %arg11[%c1_147, %c0_148, %c0_149] : memref<2x32x64xf32, #tpu.memory_space<vmem>>, vector<1x32x64xf32>
    %320 = vector.shape_cast %319 : vector<1x32x64xf32> to vector<32x64xf32>
    %cst_150 = arith.constant dense<0.000000e+00> : vector<8x64xf32>
    %321 = tpu.matmul %318, %320, %cst_150 {dimension_numbers = #tpu.dot_dimension_numbers<[1], [0], [0], [1], [0, 0, 1, 1], [], []>} : vector<8x32xf32>, vector<32x64xf32>, vector<8x64xf32> -> vector<8x64xf32>
    %c1_151 = arith.constant 1 : index
    %c0_152 = arith.constant 0 : index
    %c0_153 = arith.constant 0 : index
    %322 = vector.load %arg12[%c1_151, %c0_152, %c0_153] : memref<2x1x64xf32, #tpu.memory_space<vmem>>, vector<1x1x64xf32>
    %323 = vector.shape_cast %322 : vector<1x1x64xf32> to vector<1x64xf32>
    %324 = vector.broadcast %323 : vector<1x64xf32> to vector<8x64xf32>
    %325 = arith.addf %321, %324 : vector<8x64xf32>
    %cst_154 = arith.constant 5.000000e-01 : f32
    %326 = vector.broadcast %cst_154 : f32 to vector<8x64xf32>
    %327 = arith.mulf %326, %325 : vector<8x64xf32>
    %cst_155 = arith.constant 0.707106769 : f32
    %328 = vector.broadcast %cst_155 : f32 to vector<8x64xf32>
    %329 = arith.mulf %325, %328 : vector<8x64xf32>
    %330 = math.erf %329 : vector<8x64xf32>
    %cst_156 = arith.constant 1.000000e+00 : f32
    %331 = vector.broadcast %cst_156 : f32 to vector<8x64xf32>
    %332 = arith.addf %331, %330 : vector<8x64xf32>
    %333 = arith.mulf %327, %332 : vector<8x64xf32>
    %c1_157 = arith.constant 1 : index
    %c0_158 = arith.constant 0 : index
    %c0_159 = arith.constant 0 : index
    %334 = vector.load %arg13[%c1_157, %c0_158, %c0_159] : memref<2x64x32xf32, #tpu.memory_space<vmem>>, vector<1x64x32xf32>
    %335 = vector.shape_cast %334 : vector<1x64x32xf32> to vector<64x32xf32>
    %cst_160 = arith.constant dense<0.000000e+00> : vector<8x32xf32>
    %336 = tpu.matmul %333, %335, %cst_160 {dimension_numbers = #tpu.dot_dimension_numbers<[1], [0], [0], [1], [0, 0, 1, 1], [], []>} : vector<8x64xf32>, vector<64x32xf32>, vector<8x32xf32> -> vector<8x32xf32>
    %c1_161 = arith.constant 1 : index
    %c0_162 = arith.constant 0 : index
    %c0_163 = arith.constant 0 : index
    %337 = vector.load %arg14[%c1_161, %c0_162, %c0_163] : memref<2x1x32xf32, #tpu.memory_space<vmem>>, vector<1x1x32xf32>
    %338 = vector.shape_cast %337 : vector<1x1x32xf32> to vector<1x32xf32>
    %339 = vector.broadcast %338 : vector<1x32xf32> to vector<8x32xf32>
    %340 = arith.addf %336, %339 : vector<8x32xf32>
    %341 = arith.addf %340, %318 : vector<8x32xf32>
    %c1_164 = arith.constant 1 : index
    %c0_165 = arith.constant 0 : index
    %c0_166 = arith.constant 0 : index
    %342 = vector.load %arg15[%c1_164, %c0_165, %c0_166] : memref<2x1x32xf32, #tpu.memory_space<vmem>>, vector<1x1x32xf32>
    %343 = vector.shape_cast %342 : vector<1x1x32xf32> to vector<1x32xf32>
    %c1_167 = arith.constant 1 : index
    %c0_168 = arith.constant 0 : index
    %c0_169 = arith.constant 0 : index
    %344 = vector.load %arg16[%c1_167, %c0_168, %c0_169] : memref<2x1x32xf32, #tpu.memory_space<vmem>>, vector<1x1x32xf32>
    %345 = vector.shape_cast %344 : vector<1x1x32xf32> to vector<1x32xf32>
    %cst_170 = arith.constant dense<0.000000e+00> : vector<8xf32>
    %346 = vector.multi_reduction <add>, %341, %cst_170 [1] : vector<8x32xf32> to vector<8xf32>
    %347 = vector.shape_cast %346 : vector<8xf32> to vector<8x1xf32>
    %cst_171 = arith.constant 3.200000e+01 : f32
    %348 = vector.broadcast %cst_171 : f32 to vector<8x1xf32>
    %349 = arith.divf %347, %348 : vector<8x1xf32>
    %350 = vector.broadcast %349 : vector<8x1xf32> to vector<8x32xf32>
    %351 = arith.subf %341, %350 : vector<8x32xf32>
    %352 = arith.mulf %351, %351 : vector<8x32xf32>
    %cst_172 = arith.constant dense<0.000000e+00> : vector<8xf32>
    %353 = vector.multi_reduction <add>, %352, %cst_172 [1] : vector<8x32xf32> to vector<8xf32>
    %354 = vector.shape_cast %353 : vector<8xf32> to vector<8x1xf32>
    %cst_173 = arith.constant 3.200000e+01 : f32
    %355 = vector.broadcast %cst_173 : f32 to vector<8x1xf32>
    %356 = arith.divf %354, %355 : vector<8x1xf32>
    %cst_174 = arith.constant 9.99999974E-6 : f32
    %357 = vector.broadcast %cst_174 : f32 to vector<8x1xf32>
    %358 = arith.addf %356, %357 : vector<8x1xf32>
    %359 = math.rsqrt %358 : vector<8x1xf32>
    %360 = vector.broadcast %359 : vector<8x1xf32> to vector<8x32xf32>
    %361 = arith.mulf %351, %360 : vector<8x32xf32>
    %362 = vector.broadcast %343 : vector<1x32xf32> to vector<8x32xf32>
    %363 = arith.mulf %361, %362 : vector<8x32xf32>
    %364 = vector.broadcast %345 : vector<1x32xf32> to vector<8x32xf32>
    %365 = arith.addf %363, %364 : vector<8x32xf32>
    %c0_175 = arith.constant 0 : index
    %c0_176 = arith.constant 0 : index
    %c0_177 = arith.constant 0 : index
    %366 = vector.load %arg17[%c0_175, %c0_176, %c0_177] : memref<1x8x32xf32, #tpu.memory_space<vmem>>, vector<1x8x32xf32>
    %367 = vector.shape_cast %366 : vector<1x8x32xf32> to vector<8x32xf32>
    %368 = vector.shape_cast %365 : vector<8x32xf32> to vector<1x8x32xf32>
    tpu.vector_store %arg17[%c0_175, %c0_176, %c0_177], %368 {strides = array<i32>} : memref<1x8x32xf32, #tpu.memory_space<vmem>>, vector<1x8x32xf32>,
    return
  }
  func.func @transform_0(%arg0: i32) -> (i32, i32, i32) {
    %c0_i32 = arith.constant 0 : i32
    %c0_i32_0 = arith.constant 0 : i32
    %c0_i32_1 = arith.constant 0 : i32
    return %arg0, %c0_i32, %c0_i32_0 : i32, i32, i32
  }
  func.func @transform_1(%arg0: i32) -> (i32, i32, i32) {
    %c0_i32 = arith.constant 0 : i32
    %c0_i32_0 = arith.constant 0 : i32
    %c0_i32_1 = arith.constant 0 : i32
    return %arg0, %c0_i32, %c0_i32_0 : i32, i32, i32
  }
  func.func @transform_2(%arg0: i32) -> (i32, i32) {
    %c0_i32 = arith.constant 0 : i32
    %c0_i32_0 = arith.constant 0 : i32
    %c0_i32_1 = arith.constant 0 : i32
    return %c0_i32, %c0_i32_0 : i32, i32
  }
  func.func @transform_3(%arg0: i32) -> (i32, i32) {
    %c0_i32 = arith.constant 0 : i32
    %c0_i32_0 = arith.constant 0 : i32
    %c0_i32_1 = arith.constant 0 : i32
    return %c0_i32, %c0_i32_0 : i32, i32
  }
  func.func @transform_4(%arg0: i32) -> (i32, i32, i32) {
    %c0_i32 = arith.constant 0 : i32
    %c0_i32_0 = arith.constant 0 : i32
    %c0_i32_1 = arith.constant 0 : i32
    %c0_i32_2 = arith.constant 0 : i32
    return %c0_i32, %c0_i32_0, %c0_i32_1 : i32, i32, i32
  }
  func.func @transform_5(%arg0: i32) -> (i32, i32, i32) {
    %c0_i32 = arith.constant 0 : i32
    %c0_i32_0 = arith.constant 0 : i32
    %c0_i32_1 = arith.constant 0 : i32
    %c0_i32_2 = arith.constant 0 : i32
    return %c0_i32, %c0_i32_0, %c0_i32_1 : i32, i32, i32
  }
  func.func @transform_6(%arg0: i32) -> (i32, i32, i32) {
    %c0_i32 = arith.constant 0 : i32
    %c0_i32_0 = arith.constant 0 : i32
    %c0_i32_1 = arith.constant 0 : i32
    %c0_i32_2 = arith.constant 0 : i32
    return %c0_i32, %c0_i32_0, %c0_i32_1 : i32, i32, i32
  }
  func.func @transform_7(%arg0: i32) -> (i32, i32, i32) {
    %c0_i32 = arith.constant 0 : i32
    %c0_i32_0 = arith.constant 0 : i32
    %c0_i32_1 = arith.constant 0 : i32
    %c0_i32_2 = arith.constant 0 : i32
    return %c0_i32, %c0_i32_0, %c0_i32_1 : i32, i32, i32
  }
  func.func @transform_8(%arg0: i32) -> (i32, i32, i32) {
    %c0_i32 = arith.constant 0 : i32
    %c0_i32_0 = arith.constant 0 : i32
    %c0_i32_1 = arith.constant 0 : i32
    %c0_i32_2 = arith.constant 0 : i32
    return %c0_i32, %c0_i32_0, %c0_i32_1 : i32, i32, i32
  }
  func.func @transform_9(%arg0: i32) -> (i32, i32, i32) {
    %c0_i32 = arith.constant 0 : i32
    %c0_i32_0 = arith.constant 0 : i32
    %c0_i32_1 = arith.constant 0 : i32
    %c0_i32_2 = arith.constant 0 : i32
    return %c0_i32, %c0_i32_0, %c0_i32_1 : i32, i32, i32
  }
  func.func @transform_10(%arg0: i32) -> (i32, i32, i32) {
    %c0_i32 = arith.constant 0 : i32
    %c0_i32_0 = arith.constant 0 : i32
    %c0_i32_1 = arith.constant 0 : i32
    %c0_i32_2 = arith.constant 0 : i32
    return %c0_i32, %c0_i32_0, %c0_i32_1 : i32, i32, i32
  }
  func.func @transform_11(%arg0: i32) -> (i32, i32, i32) {
    %c0_i32 = arith.constant 0 : i32
    %c0_i32_0 = arith.constant 0 : i32
    %c0_i32_1 = arith.constant 0 : i32
    %c0_i32_2 = arith.constant 0 : i32
    return %c0_i32, %c0_i32_0, %c0_i32_1 : i32, i32, i32
  }
  func.func @transform_12(%arg0: i32) -> (i32, i32, i32) {
    %c0_i32 = arith.constant 0 : i32
    %c0_i32_0 = arith.constant 0 : i32
    %c0_i32_1 = arith.constant 0 : i32
    %c0_i32_2 = arith.constant 0 : i32
    return %c0_i32, %c0_i32_0, %c0_i32_1 : i32, i32, i32
  }
  func.func @transform_13(%arg0: i32) -> (i32, i32, i32) {
    %c0_i32 = arith.constant 0 : i32
    %c0_i32_0 = arith.constant 0 : i32
    %c0_i32_1 = arith.constant 0 : i32
    %c0_i32_2 = arith.constant 0 : i32
    return %c0_i32, %c0_i32_0, %c0_i32_1 : i32, i32, i32
  }
  func.func @transform_14(%arg0: i32) -> (i32, i32, i32) {
    %c0_i32 = arith.constant 0 : i32
    %c0_i32_0 = arith.constant 0 : i32
    %c0_i32_1 = arith.constant 0 : i32
    %c0_i32_2 = arith.constant 0 : i32
    return %c0_i32, %c0_i32_0, %c0_i32_1 : i32, i32, i32
  }
  func.func @transform_15(%arg0: i32) -> (i32, i32, i32) {
    %c0_i32 = arith.constant 0 : i32
    %c0_i32_0 = arith.constant 0 : i32
    %c0_i32_1 = arith.constant 0 : i32
    %c0_i32_2 = arith.constant 0 : i32
    return %c0_i32, %c0_i32_0, %c0_i32_1 : i32, i32, i32
  }
  func.func @transform_16(%arg0: i32) -> (i32, i32, i32) {
    %c0_i32 = arith.constant 0 : i32
    %c0_i32_0 = arith.constant 0 : i32
    %c0_i32_1 = arith.constant 0 : i32
    return %arg0, %c0_i32, %c0_i32_0 : i32, i32, i32
  }
}

</mosaic_0001>

<bundles_post_ra>
// kernel: encoder_forward.1
= control target key start
LH: loop header
LB: loop body
LE: loop exit
PB: predicated region body
PF: predicated region fallthrough
CT: control target
= control target key end

     0   :  { %s2511_s0 = inlined_call_operand.vmem [shape: f32[2,8,32], index: 0, kind: input, shape index: {}]   ;;  %s2512_s1 = inlined_call_operand.vmem [shape: f32[2,1,8], index: 1, kind: input, shape index: {}]   ;;  %s2513_s2 = inlined_call_operand.vmem [shape: f32[1,32], index: 2, kind: input, shape index: {}]   ;;  %s2514_s3 = inlined_call_operand.vmem [shape: f32[1,32], index: 3, kind: input, shape index: {}]   ;;  %s2515_s4 = inlined_call_operand.vmem [shape: f32[2,32,96], index: 4, kind: input, shape index: {}]   ;;  %s2516_s5 = inlined_call_operand.vmem [shape: f32[2,1,96], index: 5, kind: input, shape index: {}]   ;;  %s2517_s6 = inlined_call_operand.vmem [shape: f32[2,32,32], index: 6, kind: input, shape index: {}]   ;;  %s2518_s7 = inlined_call_operand.vmem [shape: f32[2,1,32], index: 7, kind: input, shape index: {}]   ;;  %s2519_s8 = inlined_call_operand.vmem [shape: f32[2,1,32], index: 8, kind: input, shape index: {}]   ;;  %s2520_s9 = inlined_call_operand.vmem [shape: f32[2,1,32], index: 9, kind: input, shape index: {}]   ;;  %s2521_s10 = inlined_call_operand.vmem [shape: f32[2,32,64], index: 10, kind: input, shape index: {}]   ;;  %s2522_s11 = inlined_call_operand.vmem [shape: f32[2,1,64], index: 11, kind: input, shape index: {}]   ;;  %s2523_s12 = inlined_call_operand.vmem [shape: f32[2,64,32], index: 12, kind: input, shape index: {}]   ;;  %s2524_s13 = inlined_call_operand.vmem [shape: f32[2,1,32], index: 13, kind: input, shape index: {}]   ;;  %s2525_s14 = inlined_call_operand.vmem [shape: f32[2,1,32], index: 14, kind: input, shape index: {}]   ;;  %s2526_s15 = inlined_call_operand.vmem [shape: f32[2,1,32], index: 15, kind: input, shape index: {}]   ;;  %s2527_s16 = inlined_call_operand.hbm [shape: f32[2,8,32], index: 16, kind: output, shape index: {}]  }
   0x1   :  { %2544 = sst [smem:[#allocation9_spill]] %s2511_s0 }
   0x2   :  { %2545 = sst [smem:[#allocation10_spill]] %s2512_s1 }
   0x3   :  { %2546 = sst [smem:[#allocation11_spill]] %s2513_s2 }
   0x4   :  { %2547 = sst [smem:[#allocation12_spill]] %s2514_s3 }
   0x5   :  { %21 = vsyncpa [#allocation4], 0 }
   0x6   :  { %23 = vsyncpa [#allocation4 + $0x1], 0  ;;  %s2079_s21 = smov 0   ;;  %s2081_s22 = smov 0  }
   0x7   :  { %s2083_s23 = smov 0   ;;  %s2085_s24 = smov 0  }
   0x8 LB: > { %2548 = sst [smem:[#allocation6_spill]] %s1973_s23  ;;  %s2100_s25 = sadd.s32 4294967295, %s1977_s24   ;;  %s1977_s24 = sphi %s2085_s24, %s2571_s24   ;;  %s1973_s23 = sphi %s2083_s23, %s2573_s23   ;;  %s1969_s22 = sphi %s2081_s22, %s2575_s22   ;;  %s1965_s21 = sphi %s2079_s21, %s2574_s21  }
   0x9   : > { %s1722_s26 = sadd.s32 4294967294, %s1977_s24   ;;  %s2104_s27 = sadd.s32 1, %s1977_s24  }
   0xa   : > { %2549 = sst [smem:[#allocation7_spill]] %s2104_s27  ;;  %s382_s28 = sadd.s32 1, %s1973_s23 }
   0xb   : > { %s379_s29 = ssub.s32 %s1977_s24, %s2104_s27  ;;  %p392_p0 = scmp.ne.s32.totalorder %s1973_s23, %s1969_s22 }
   0xc   : > { %p380_p1 = scmp.eq.s32.totalorder %s379_s29, 0  ;;  %p393_p2 = scmp.eq.s32.totalorder %s2100_s25, 1 }
   0xd   : > { %p398_p3 = scmp.ne.s32.totalorder %s1969_s22, %s1965_s21  ;;  %p399_p4 = scmp.eq.s32.totalorder %s1722_s26, 1 }
   0xe   : > { %s2115_s30 = scalar_select %p380_p1, %s1973_s23, %s382_s28  }
   0xf   : > { %p2117_p5 = por %p393_p2, %p392_p0  ;;  %p2121_p6 = por %p399_p4, %p398_p3 }
  0x10   : > { %2550 = sst [smem:[#allocation8_spill]] %s2115_s30  ;;  %p1725_p7 = scmp.ge.s32.totalorder %s1977_s24, 1 }
  0x11   : > { %p472_p8 = scmp.lt.s32.totalorder %s1977_s24, 3 }
  0x13   : > { %p473_p9 = pnand %p1725_p7, %p472_p8 }
  0x14   : > { %p524_p10 = scmp.lt.s32.totalorder (!%p473_p9), %s2100_s25, 1  ;;  %s2553_s1 = sld [smem:[#allocation10_spill]] (!%p473_p9) }
  0x15   : > { %476 = sbr.rel (%p473_p9) target bundleno = 4873 (0x1309), region = 84  ;;  %s2554_s23 = sld [smem:[#allocation9_spill]] (!%p473_p9) }
  0x16   : > { %s2555_s2 = sld [smem:[#allocation11_spill]] (!%p473_p9)  ;;  %s2532_s26 = smov (!%p473_p9), 88  }
  0x17   : > { %s2556_s3 = sld [smem:[#allocation12_spill]] (!%p473_p9)  ;;  %s2542_s29 = smov (!%p473_p9), 64  }
  0x18   : > { %s2540_s28 = smov (!%p473_p9), 120   ;;  %s2533_s30 = smov (!%p473_p9), 112  }
  0x19   : > { %s2536_s20 = smov (!%p473_p9), 16  }
  0x1a   : > { %s2129_s18 = scalar_select %p524_p10, %s2100_s25, 1  ;;  %vm535_vm0 = vcmask 261120   ;;  %v1979_v2 = vmov 32.0   ;;  %v576_v14 = vld [vmem:[%s2515_s4 + $0x18] sm:$0xff]  ;;  %v575_v15 = vld [vmem:[%s2515_s4 + $0x10] sm:$0xff]  ;;  %v574_v16 = vld [vmem:[%s2515_s4 + $0x8] sm:$0xff] }
  0x1b   : > { %1867 = vrcp.f32 %v1979_v2  ;;  %596 = vmatpush.msra.mxu0 %v576_v14  ;;  %v573_v17 = vld [vmem:[%s2515_s4] sm:$0xff]  ;;  %vm607_vm5 = vcmask 64512   ;;  %vm746_vm6 = vcmask 130112   ;;  %vm819_vm7 = vcmask 195712  }
  0x1c   : > { %s1727_s19 = sshll.u32 %s2129_s18, 3  ;;  %v1849_v27 = vld [vmem:[%s2555_s2] ss:$0 sm:$0xff]  ;;  %vm892_vm8 = vcmask 261312  }
  0x1d   : > { %s527_s27 = scalar_lea.vmem %s2554_s23, %s1727_s19  ;;  %597 = vmatpush.msra.mxu0 %v575_v15  ;;  %v1850_v30 = vld [vmem:[%s2556_s3] ss:$0 sm:$0xff]  ;;  %s2541_s23 = smov 96  }
  0x1e   : > { %v532_v0 = vld [vmem:[%s527_s27] sm:$0xff]  ;;  %s2539_s27 = smov 80   ;;  %s2531_s19 = smov 72  }
  0x1f   : > { %v536_v1 = vsel %vm535_vm0, %v532_v0, 0.0  ;;  %598 = vmatpush.msra.mxu0 %v574_v16  ;;  %v1851_v33 = vld [vmem:[%s2516_s5] ss:$0 sm:$0xff] }
  0x20   : > { %537 = vadd.xlane.f32.xlu0 %v536_v1 }
  0x21   : > { %v1868_v3 = vpop.eup %1867  ;;  %599 = vmatpush.msra.mxu0 %v573_v17 }
  0x22   : > { %v540_v4 = vmul.f32 32.0, %v1868_v3  ;;  %vm544_vm1 = vweird.f32 %v1868_v3 }
  0x24   : > { %v541_v5 = vsub.f32 1.0, %v540_v4 }
  0x26   : > { %v542_v6 = vmul.f32 %v1868_v3, %v541_v5 }
  0x28   : > { %v543_v7 = vadd.f32 %v1868_v3, %v542_v6 }
  0x2a   : > { %v2140_v8 = vsel %vm544_vm1, %v1868_v3, %v543_v7  ;;  %vm1046_vm1 = vcmask 523264  }
  0x93   : > { %v538_v9 = vpop.xlane.xlu0 %537 }
  0x94   : > { %v546_v10 = vmul.f32 %v2140_v8, %v538_v9 }
  0x96   : > { %v547_v11 = vsub.f32 %v532_v0, %v546_v10 }
  0x98   : > { %v548_v12 = vmul.f32 %v547_v11, %v547_v11 }
  0x9a   : > { %v549_v13 = vsel %vm535_vm0, %v548_v12, 0.0 }
  0x9b   : > { %550 = vadd.xlane.f32.xlu0 %v549_v13 }
 0x10e   : > { %v551_v18 = vpop.xlane.xlu0 %550 }
 0x10f   : > { %v552_v19 = vmul.f32 %v551_v18, %v2140_v8 }
 0x111   : > { %v553_v20 = vadd.f32 1e-05, %v552_v19 }
 0x113   : > { %1869 = vrsqrt.f32 %v553_v20  ;;  %vm560_vm3 = vweird.f32 %v553_v20 }
 0x119   : > { %v1870_v21 = vpop.eup %1869 }
 0x11a   : > { %v555_v22 = vmul.f32 %v1870_v21, %v553_v20  ;;  %vm561_vm2 = vweird.f32 %v1870_v21 }
 0x11b   : > { %vm562_vm4 = vmor %vm560_vm3, %vm561_vm2 }
 0x11c   : > { %v556_v23 = vmul.f32 %v1870_v21, %v555_v22 }
 0x11e   : > { %v557_v24 = vmul.f32 0.5, %v556_v23 }
 0x120   : > { %v558_v25 = vsub.f32 1.5, %v557_v24 }
 0x122   : > { %v559_v26 = vmul.f32 %v1870_v21, %v558_v25 }
 0x124   : > { %v563_v28 = vsel %vm562_vm4, %v1870_v21, %v559_v26 }
 0x125   : > { %v564_v29 = vmul.f32 %v563_v28, %v547_v11 }
 0x127   : > { %v568_v31 = vmul.f32 %v1849_v27, %v564_v29 }
 0x129   : > { %v2163_v32 = vadd.f32 %v1850_v30, %v568_v31 }
 0x12b   : > { %1728 = vmatmul.msk.f32.vlgmr.msra.gmra.mxu0 %vm535_vm0, %v2163_v32 }
 0x1a8   : > { %v601_v34 = vpop.f32.mrf.mxu0 }
 0x1a9   : > { %v2170_v35 = vadd.f32 %v1851_v33, %v601_v34 }
 0x1ab   : > { %677 = vrot.lane.b32.xlu0 %v2170_v35, %s2532_s26  ;;  %648 = vrot.lane.b32.xlu2 %v2170_v35, %s2542_s29  ;;  %s2557_s26 = scalar_lea.vmem %s2553_s1, %s2129_s18  ;;  %s2538_s18 = smov 104  }
 0x1ac   : > { %605 = vrot.lane.b32.xlu1 %v2170_v35, %s2541_s23  ;;  %v2198_v43 = vld [vmem:[%s2557_s26] ss:$0 sm:$0xff]  ;;  %s2535_s26 = smov 40   ;;  %s2558_s23 = smov 64  }
 0x1ad   : > { %s2559_s29 = smov 96  }
 0x1b3   : > { %750 = vrot.lane.b32.xlu0 %v2170_v35, %s2539_s27  ;;  %675 = vrot.lane.b32.xlu2 %v2170_v35, %s2540_s28  ;;  %s2560_s27 = smov 120   ;;  %s2561_s28 = smov 80  }
 0x1bb   : > { %748 = vrot.lane.b32.xlu0 %v2170_v35, %s2533_s30  ;;  %823 = vrot.lane.b32.xlu2 %v2170_v35, %s2531_s19  ;;  %s2534_s30 = smov 48   ;;  %s2537_s19 = smov 56  }
 0x205   : > { %v649_v36 = vpop.permute.xlu2 %648 }
 0x206   : > { %669 = vmatpush.msra.mxu3 %v649_v36 }
 0x20d   : > { %v676_v37 = vpop.permute.xlu2 %675 }
 0x215   : > { %v824_v38 = vpop.permute.xlu2 %823 }
 0x216   : > { %1738 = vmatpush.xpose.msk.msrb.mxu0 %vm607_vm5, %v824_v38  ;;  %v898_v38 = vld [vmem:[%s2517_s6 + $0x18] sm:$0xff] }
 0x21d   : > { %v678_v39 = vpop.permute.xlu0 %677 }
 0x21e   : > { %v606_v40 = vpop.permute.xlu1 %605  ;;  %1732 = vmatpush.xpose.msk.msrb.mxu3 %vm607_vm5, %v678_v39  ;;  %v897_v39 = vld [vmem:[%s2517_s6 + $0x10] sm:$0xff] }
 0x21f   : > { %1729 = vmatpush.xpose.msk.msra.mxu1 %vm607_vm5, %v606_v40  ;;  %v896_v40 = vld [vmem:[%s2517_s6 + $0x8] sm:$0xff] }
 0x222   : > { %1730 = vmatmul.msk.f32.vlgmr.msra.gmra.mxu1 %vm607_vm5, %v2170_v35 }
 0x225   : > { %v751_v41 = vpop.permute.xlu0 %750 }
 0x226   : > { %1735 = vmatpush.xpose.msk.msrb.mxu1 %vm607_vm5, %v751_v41  ;;  %v895_v41 = vld [vmem:[%s2517_s6] sm:$0xff] }
 0x22a   : > { %918 = vmatpush.msra.mxu1 %v898_v38 }
 0x22c   : > { %919 = vmatpush.msra.mxu1 %v897_v39 }
 0x22d   : > { %v749_v42 = vpop.permute.xlu0 %748 }
 0x22e   : > { %1736 = vmatmul.msk.f32.vlgmr.msrb.gmra.mxu1 %vm607_vm5, %v749_v42 }
 0x22f   : > { %920 = vmatpush.msra.mxu1 %v896_v40 }
 0x231   : > { %921 = vmatpush.msra.mxu1 %v895_v41 }
 0x29f   : > { %v629_v44 = vpop.f32.mrf.mxu1 }
 0x2a0   : > { %v632_v45 = vmul.f32 0.35355338, %v629_v44 }
 0x2a2   : > { %v636_v46 = vadd.f32 %v2198_v43, %v632_v45 }
 0x2a4   : > { %v637_v47 = vsel %vm607_vm5, %v636_v46, -inf }
 0x2a5   : > { %638 = vmax.xlane.f32.xlu1 %v637_v47  ;;  %v1852_v47 = vld [vmem:[%s2518_s7] ss:$0 sm:$0xff] }
 0x2ab   : > { %v773_v48 = vpop.f32.mrf.mxu1 }
 0x2ac   : > { %v776_v49 = vmul.f32 0.35355338, %v773_v48 }
 0x2ae   : > { %v777_v50 = vadd.f32 %v2198_v43, %v776_v49 }
 0x2b0   : > { %v778_v51 = vsel %vm607_vm5, %v777_v50, -inf }
 0x2b1   : > { %779 = vmax.xlane.f32.xlu0 %v778_v51 }
 0x2c5   : > { %789 = vrot.lane.b32.xlu0 %v2170_v35, %s2534_s30  ;;  %s2543_s30 = smov 8  }
 0x318   : > { %v639_v52 = vpop.xlane.xlu1 %638 }
 0x319   : > { %v640_v53 = vsub.f32 %v636_v46, %v639_v52 }
 0x31b   : > { %v641_v54 = vmul.f32 1.442695, %v640_v53 }
 0x31d   : > { %1871 = vpow2.f32 %v641_v54 }
 0x323   : > { %v1872_v55 = vpop.eup %1871 }
 0x324   : > { %v643_v56 = vsel %vm607_vm5, %v1872_v55, 0.0  ;;  %v780_v58 = vpop.xlane.xlu0 %779 }
 0x325   : > { %644 = vadd.xlane.f32.xlu2 %v643_v56  ;;  %v781_v4 = vsub.f32 %v777_v50, %v780_v58  ;;  %v960_v58 = vld [vmem:[%s2521_s10 + $0x8] sm:$0xff] }
 0x327   : > { %v782_v5 = vmul.f32 1.442695, %v781_v4 }
 0x337   : > { %v790_v62 = vpop.permute.xlu0 %789 }
 0x33d   : > { %821 = vrot.lane.b32.xlu2 %v2170_v35, %s2538_s18  ;;  %s2563_s18 = smov 88  }
 0x398   : > { %v645_v57 = vpop.xlane.xlu2 %644 }
 0x399   : > { %1873 = vrcp.f32 %v645_v57  ;;  %v962_v57 = vld [vmem:[%s2521_s10 + $0x18] sm:$0xff] }
 0x39a   : > { %1875 = vpow2.f32 %v782_v5  ;;  %v1853_v5 = vld [vmem:[%s2519_s8] ss:$0 sm:$0xff] }
 0x39f   : > { %v1874_v59 = vpop.eup %1873 }
 0x3a0   : > { %v822_v60 = vpop.permute.xlu2 %821  ;;  %v647_v61 = vmul.f32 %v1874_v59, %v1872_v55  ;;  %v1876_v11 = vpop.eup %1875  ;;  %v959_v59 = vld [vmem:[%s2521_s10] sm:$0xff] }
 0x3a1   : > { %1739 = vmatmul.msk.f32.vlgmr.msrb.gmra.mxu0 %vm607_vm5, %v822_v60  ;;  %v784_v12 = vsel %vm607_vm5, %v1876_v11, 0.0 }
 0x3a2   : > { %1731 = vmatmul.msk.f32.vlgmr.msra.gmra.mxu3 %vm607_vm5, %v647_v61 }
 0x3a3   : > { %810 = vmatpush.msra.mxu3 %v790_v62 }
 0x3aa   : > { %1733 = vmatmul.msk.f32.vlgmr.msrb.gmra.mxu3 %vm607_vm5, %v676_v37 }
 0x3ab   : > { %982 = vmatpush.msrb.mxu3 %v962_v57 }
 0x41e   : > { %v846_v63 = vpop.f32.mrf.mxu0 }
 0x41f   : > { %v849_v0 = vmul.f32 0.35355338, %v846_v63 }
 0x421   : > { %v850_v1 = vadd.f32 %v2198_v43, %v849_v0 }
 0x423   : > { %v851_v2 = vsel %vm607_vm5, %v850_v1, -inf }
 0x424   : > { %852 = vmax.xlane.f32.xlu2 %v851_v2 }
 0x425   : > { %v671_v3 = vpop.f32.mrf.mxu3 }
 0x426   : > { %674 = vst.msk [vmem:[#allocation2] sm:$0xff] %vm607_vm5, %v671_v3 }
 0x42d   : > { %v700_v6 = vpop.f32.mrf.mxu3 }
 0x42e   : > { %v703_v7 = vmul.f32 0.35355338, %v700_v6 }
 0x430   : > { %v704_v9 = vadd.f32 %v2198_v43, %v703_v7 }
 0x432   : > { %v705_v10 = vsel %vm607_vm5, %v704_v9, -inf }
 0x433   : > { %706 = vmax.xlane.f32.xlu1 %v705_v10 }
 0x43b   : > { %785 = vadd.xlane.f32.xlu1 %v784_v12  ;;  %v1855_v12 = vld [vmem:[%s2522_s11] ss:$0 sm:$0xff] }
 0x43c   : > { %862 = vrot.lane.b32.xlu2 %v2170_v35, %s2535_s26  ;;  %s1993_s26 = smov 24  }
 0x497   : > { %v853_v13 = vpop.xlane.xlu2 %852 }
 0x498   : > { %v854_v14 = vsub.f32 %v850_v1, %v853_v13 }
 0x49a   : > { %v855_v15 = vmul.f32 1.442695, %v854_v14 }
 0x49c   : > { %1877 = vpow2.f32 %v855_v15 }
 0x49f   : > { %v863_v33 = vpop.permute.xlu2 %862 }
 0x4a2   : > { %v1878_v16 = vpop.eup %1877 }
 0x4a3   : > { %v857_v17 = vsel %vm607_vm5, %v1878_v16, 0.0 }
 0x4a4   : > { %858 = vadd.xlane.f32.xlu1 %v857_v17 }
 0x4a6   : > { %v707_v18 = vpop.xlane.xlu1 %706 }
 0x4a7   : > { %v708_v19 = vsub.f32 %v704_v9, %v707_v18  ;;  %v1854_v9 = vld [vmem:[%s2520_s9] ss:$0 sm:$0xff]  ;;  %v1041_v18 = vld [vmem:[%s2523_s12 + $0x38] sm:$0xff] }
 0x4a8   : > { %1058 = vmatpush.msra.mxu0 %v1041_v18 }
 0x4a9   : > { %v709_v20 = vmul.f32 1.442695, %v708_v19 }
 0x4ab   : > { %1879 = vpow2.f32 %v709_v20 }
 0x4ae   : > { %v786_v21 = vpop.xlane.xlu1 %785 }
 0x4af   : > { %1881 = vrcp.f32 %v786_v21  ;;  %v1040_v21 = vld [vmem:[%s2523_s12 + $0x30] sm:$0xff] }
 0x4b0   : > { %1059 = vmatpush.msra.mxu0 %v1040_v21 }
 0x4b1   : > { %v1880_v22 = vpop.eup %1879 }
 0x4b2   : > { %v711_v23 = vsel %vm607_vm5, %v1880_v22, 0.0 }
 0x4b3   : > { %712 = vadd.xlane.f32.xlu1 %v711_v23 }
 0x4b5   : > { %v1882_v24 = vpop.eup %1881 }
 0x4b6   : > { %v788_v25 = vmul.f32 %v1882_v24, %v1876_v11  ;;  %v1039_v24 = vld [vmem:[%s2523_s12 + $0x28] sm:$0xff] }
 0x4b7   : > { %1060 = vmatpush.msra.mxu0 %v1039_v24 }
 0x4b8   : > { %1737 = vmatmul.msk.f32.vlgmr.msra.gmra.mxu3 %vm607_vm5, %v788_v25 }
 0x4cc   : > { %716 = vrot.lane.b32.xlu1 %v2170_v35, %s2537_s19  ;;  %s2564_s19 = smov 72  }
 0x517   : > { %v859_v26 = vpop.xlane.xlu1 %858 }
 0x526   : > { %v713_v27 = vpop.xlane.xlu1 %712 }
 0x527   : > { %1883 = vrcp.f32 %v713_v27  ;;  %v1038_v27 = vld [vmem:[%s2523_s12 + $0x20] sm:$0xff] }
 0x528   : > { %1885 = vrcp.f32 %v859_v26  ;;  %1061 = vmatpush.msra.mxu0 %v1038_v27 }
 0x52d   : > { %v1884_v28 = vpop.eup %1883 }
 0x52e   : > { %v715_v31 = vmul.f32 %v1884_v28, %v1880_v22  ;;  %v1886_v34 = vpop.eup %1885 }
 0x52f   : > { %v861_v36 = vmul.f32 %v1886_v34, %v1878_v16 }
 0x53b   : > { %v812_v29 = vpop.f32.mrf.mxu3 }
 0x53c   : > { %816 = vrot.lane.b32.xlu0 %v812_v29, %s2536_s20  ;;  %v1037_v29 = vld [vmem:[%s2523_s12 + $0x18] sm:$0xff]  ;;  %s2565_s20 = smov 104  }
 0x53d   : > { %1062 = vmatpush.msra.mxu0 %v1037_v29  ;;  %v1859_v29 = vld [vmem:[%s2516_s5 + $0x1] ss:$0 sm:$0xff] }
 0x53e   : > { %v717_v30 = vpop.permute.xlu1 %716 }
 0x53f   : > { %737 = vmatpush.msra.mxu2 %v717_v30 }
 0x540   : > { %1734 = vmatmul.msk.f32.vlgmr.msra.gmra.mxu2 %vm607_vm5, %v715_v31 }
 0x541   : > { %883 = vmatpush.msrb.mxu2 %v863_v33  ;;  %v1036_v33 = vld [vmem:[%s2523_s12 + $0x10] sm:$0xff] }
 0x542   : > { %1063 = vmatpush.msra.mxu0 %v1036_v33 }
 0x548   : > { %1740 = vmatmul.msk.f32.vlgmr.msrb.gmra.mxu2 %vm607_vm5, %v861_v36  ;;  %v1035_v36 = vld [vmem:[%s2523_s12 + $0x8] sm:$0xff] }
 0x549   : > { %1064 = vmatpush.msra.mxu0 %v1035_v36 }
 0x5ae   : > { %v817_v44 = vpop.permute.xlu0 %816 }
 0x5c3   : > { %v739_v35 = vpop.f32.mrf.mxu2 }
 0x5c4   : > { %743 = vrot.lane.b32.xlu1 %v739_v35, %s2543_s30  ;;  %s2562_s30 = smov 112  }
 0x5cb   : > { %v885_v37 = vpop.f32.mrf.mxu2 }
 0x5cc   : > { %889 = vrot.lane.b32.xlu1 %v885_v37, %s1993_s26  ;;  %v1034_v37 = vld [vmem:[%s2523_s12] sm:$0xff] }
 0x5cd   : > { %1065 = vmatpush.msra.mxu0 %v1034_v37 }
 0x636   : > { %v744_v42 = vpop.permute.xlu1 %743 }
 0x637   : > { %747 = vst.msk [vmem:[#allocation2] sm:$0xff] %vm746_vm6, %v744_v42 }
 0x638   : > { %820 = vst.msk [vmem:[#allocation2] sm:$0xff] %vm819_vm7, %v817_v44 }
 0x63e   : > { %v890_v45 = vpop.permute.xlu1 %889 }
 0x63f   : > { %893 = vst.msk [vmem:[#allocation2] sm:$0xff] %vm892_vm8, %v890_v45 }
 0x646   : > { %v894_v46 = vld [vmem:[#allocation2] sm:$0xff] }
 0x647   : > { %1741 = vmatmul.msk.f32.vlgmr.msra.gmra.mxu1 %vm535_vm0, %v894_v46 }
 0x6c4   : > { %v923_v48 = vpop.f32.mrf.mxu1 }
 0x6c5   : > { %v924_v49 = vadd.f32 %v1852_v47, %v923_v48 }
 0x6c7   : > { %v926_v50 = vadd.f32 %v924_v49, %v2163_v32  ;;  %v961_v32 = vld [vmem:[%s2521_s10 + $0x10] sm:$0xff] }
 0x6c8   : > { %983 = vmatpush.msrb.mxu3 %v961_v32 }
 0x6c9   : > { %v929_v51 = vsel %vm535_vm0, %v926_v50, 0.0 }
 0x6ca   : > { %930 = vadd.xlane.f32.xlu2 %v929_v51  ;;  %984 = vmatpush.msrb.mxu3 %v960_v58 }
 0x6cc   : > { %985 = vmatpush.msrb.mxu3 %v959_v59 }
 0x73d   : > { %v931_v52 = vpop.xlane.xlu2 %930 }
 0x73e   : > { %v932_v53 = vmul.f32 %v931_v52, %v2140_v8 }
 0x740   : > { %v933_v54 = vsub.f32 %v926_v50, %v932_v53 }
 0x742   : > { %v934_v55 = vmul.f32 %v933_v54, %v933_v54 }
 0x744   : > { %v935_v56 = vsel %vm535_vm0, %v934_v55, 0.0 }
 0x745   : > { %936 = vadd.xlane.f32.xlu0 %v935_v56 }
 0x7b8   : > { %v937_v60 = vpop.xlane.xlu0 %936 }
 0x7b9   : > { %v938_v61 = vmul.f32 %v937_v60, %v2140_v8 }
 0x7bb   : > { %v939_v62 = vadd.f32 1e-05, %v938_v61 }
 0x7bd   : > { %1887 = vrsqrt.f32 %v939_v62  ;;  %vm946_vm10 = vweird.f32 %v939_v62 }
 0x7c3   : > { %v1888_v63 = vpop.eup %1887 }
 0x7c4   : > { %v941_v0 = vmul.f32 %v1888_v63, %v939_v62  ;;  %vm947_vm9 = vweird.f32 %v1888_v63 }
 0x7c5   : > { %vm948_vm11 = vmor %vm946_vm10, %vm947_vm9 }
 0x7c6   : > { %v942_v1 = vmul.f32 %v1888_v63, %v941_v0 }
 0x7c8   : > { %v943_v2 = vmul.f32 0.5, %v942_v1 }
 0x7ca   : > { %v944_v3 = vsub.f32 1.5, %v943_v2 }
 0x7cc   : > { %v945_v4 = vmul.f32 %v1888_v63, %v944_v3 }
 0x7ce   : > { %v949_v6 = vsel %vm948_vm11, %v1888_v63, %v945_v4  ;;  %v1856_v63 = vld [vmem:[%s2524_s13] ss:$0 sm:$0xff] }
 0x7cf   : > { %v950_v7 = vmul.f32 %v949_v6, %v933_v54 }
 0x7d1   : > { %v954_v10 = vmul.f32 %v1853_v5, %v950_v7 }
 0x7d3   : > { %v2272_v11 = vadd.f32 %v1854_v9, %v954_v10  ;;  %v1748_v10 = vld [vmem:[%s2515_s4 + $0x38] sm:$0xff] }
 0x7d4   : > { %1128 = vmatpush.msra.mxu2 %v1748_v10 }
 0x7d5   : > { %1742 = vmatmul.msk.f32.vlgmr.msrb.gmra.mxu3 %vm535_vm0, %v2272_v11 }
 0x858   : > { %v987_v13 = vpop.f32.mrf.mxu3 }
 0x859   : > { %v988_v14 = vadd.f32 %v1855_v12, %v987_v13  ;;  %v1746_v12 = vld [vmem:[%s2515_s4 + $0x28] sm:$0xff]  ;;  %v1745_v13 = vld [vmem:[%s2515_s4 + $0x20] sm:$0xff] }
 0x85b   : > { %v991_v15 = vmul.f32 0.70710677, %v988_v14  ;;  %v990_v60 = vmul.f32 0.5, %v988_v14 }
 0x85d   : > { %v992_v16 = vmul.f32 %v991_v15, %v991_v15 }
 0x85f   : > { %v993_v17 = vmin.f32 %v992_v16, 16.0 }
 0x861   : > { %v994_v19 = vmul.f32 2.1237322e-06, %v993_v17  ;;  %v1005_v20 = vmul.f32 3.8918573e-05, %v993_v17 }
 0x863   : > { %v995_v22 = vadd.f32 0.00028619796, %v994_v19  ;;  %v1006_v23 = vadd.f32 0.001143296, %v1005_v20 }
 0x865   : > { %v996_v25 = vmul.f32 %v995_v22, %v993_v17  ;;  %v1007_v26 = vmul.f32 %v1006_v23, %v993_v17  ;;  %v1857_v23 = vld [vmem:[%s2525_s14] ss:$0 sm:$0xff] }
 0x867   : > { %v1008_v28 = vadd.f32 0.014752088, %v1007_v26  ;;  %v997_v30 = vadd.f32 0.0036580483, %v996_v25  ;;  %v1858_v26 = vld [vmem:[%s2526_s15] ss:$0 sm:$0xff] }
 0x869   : > { %v1009_v31 = vmul.f32 %v1008_v28, %v993_v17  ;;  %v998_v35 = vmul.f32 %v997_v30, %v993_v17 }
 0x86b   : > { %v1010_v34 = vadd.f32 0.112945676, %v1009_v31  ;;  %v999_v40 = vadd.f32 0.05243302, %v998_v35 }
 0x86d   : > { %v1011_v38 = vmul.f32 %v1010_v34, %v993_v17  ;;  %v1000_v44 = vmul.f32 %v999_v40, %v993_v17 }
 0x86f   : > { %v1012_v39 = vadd.f32 0.4994258, %v1011_v38  ;;  %v1001_v45 = vadd.f32 0.18741608, %v1000_v44 }
 0x871   : > { %v1013_v41 = vmul.f32 %v1012_v39, %v993_v17  ;;  %v1002_v47 = vmul.f32 %v1001_v45, %v993_v17 }
 0x873   : > { %v1014_v42 = vadd.f32 1.0, %v1013_v41  ;;  %v1003_v51 = vadd.f32 1.1283791, %v1002_v47 }
 0x875   : > { %1889 = vrcp.f32 %v1014_v42  ;;  %v1026_v50 = vand.u32 2147483648, %v1014_v42  ;;  %v1024_v53 = vand.u32 2147483647, %v1014_v42  ;;  %vm1020_vm13 = vweird.f32 %v1014_v42 }
 0x876   : > { %v1004_v56 = vmul.f32 %v1003_v51, %v991_v15 }
 0x877   : > { %v1027_v55 = vor.u32 1.1754944e-38, %v1026_v50  ;;  %vm1025_vm15 = vcmp.eq.f32.partialorder %v1024_v53, 8.507059e+37 }
 0x87b   : > { %v1890_v46 = vpop.eup %1889 }
 0x87c   : > { %v1016_v48 = vmul.f32 %v1890_v46, %v1014_v42  ;;  %vm1021_vm12 = vweird.f32 %v1890_v46 }
 0x87d   : > { %vm1022_vm14 = vmor %vm1020_vm13, %vm1021_vm12 }
 0x87e   : > { %v1017_v49 = vsub.f32 1.0, %v1016_v48 }
 0x880   : > { %v1018_v52 = vmul.f32 %v1890_v46, %v1017_v49 }
 0x882   : > { %v1019_v54 = vadd.f32 %v1890_v46, %v1018_v52 }
 0x884   : > { %v1023_v57 = vsel %vm1022_vm14, %v1890_v46, %v1019_v54 }
 0x885   : > { %v1028_v32 = vsel %vm1025_vm15, %v1027_v55, %v1023_v57 }
 0x886   : > { %v1029_v58 = vmul.f32 %v1028_v32, %v1004_v56 }
 0x888   : > { %v1743_v59 = vclamps-f32 %v1029_v58, 1.0 }
 0x88a   : > { %v1032_v61 = vadd.f32 1.0, %v1743_v59 }
 0x88c   : > { %v1033_v62 = vmul.f32 %v1032_v61, %v990_v60 }
 0x88e   : > { %1744 = vmatmul.msk.f32.vlgmr.msra.gmra.mxu0 %vm1046_vm1, %v1033_v62 }
 0x90b   : > { %v1067_v0 = vpop.f32.mrf.mxu0 }
 0x90c   : > { %v1068_v1 = vadd.f32 %v1856_v63, %v1067_v0 }
 0x90e   : > { %v1070_v2 = vadd.f32 %v1068_v1, %v2272_v11  ;;  %v1747_v11 = vld [vmem:[%s2515_s4 + $0x30] sm:$0xff] }
 0x90f   : > { %1129 = vmatpush.msra.mxu2 %v1747_v11 }
 0x910   : > { %v1073_v3 = vsel %vm535_vm0, %v1070_v2, 0.0 }
 0x911   : > { %1074 = vadd.xlane.f32.xlu1 %v1073_v3  ;;  %1130 = vmatpush.msra.mxu2 %v1746_v12 }
 0x913   : > { %1131 = vmatpush.msra.mxu2 %v1745_v13 }
 0x984   : > { %v1075_v4 = vpop.xlane.xlu1 %1074 }
 0x985   : > { %v1076_v5 = vmul.f32 %v1075_v4, %v2140_v8 }
 0x987   : > { %v1077_v6 = vsub.f32 %v1070_v2, %v1076_v5 }
 0x989   : > { %v1078_v7 = vmul.f32 %v1077_v6, %v1077_v6 }
 0x98b   : > { %v1079_v9 = vsel %vm535_vm0, %v1078_v7, 0.0 }
 0x98c   : > { %1080 = vadd.xlane.f32.xlu2 %v1079_v9 }
 0x9ff   : > { %v1081_v14 = vpop.xlane.xlu2 %1080 }
 0xa00   : > { %v1082_v15 = vmul.f32 %v1081_v14, %v2140_v8 }
 0xa02   : > { %v1083_v16 = vadd.f32 1e-05, %v1082_v15 }
 0xa04   : > { %1891 = vrsqrt.f32 %v1083_v16  ;;  %vm1090_vm3 = vweird.f32 %v1083_v16 }
 0xa0a   : > { %v1892_v17 = vpop.eup %1891 }
 0xa0b   : > { %v1085_v18 = vmul.f32 %v1892_v17, %v1083_v16  ;;  %vm1091_vm2 = vweird.f32 %v1892_v17 }
 0xa0c   : > { %vm1092_vm4 = vmor %vm1090_vm3, %vm1091_vm2 }
 0xa0d   : > { %v1086_v19 = vmul.f32 %v1892_v17, %v1085_v18 }
 0xa0f   : > { %v1087_v20 = vmul.f32 0.5, %v1086_v19 }
 0xa11   : > { %v1088_v21 = vsub.f32 1.5, %v1087_v20 }
 0xa13   : > { %v1089_v22 = vmul.f32 %v1892_v17, %v1088_v21 }
 0xa15   : > { %v1093_v24 = vsel %vm1092_vm4, %v1892_v17, %v1089_v22 }
 0xa16   : > { %v1094_v25 = vmul.f32 %v1093_v24, %v1077_v6 }
 0xa18   : > { %v1098_v27 = vmul.f32 %v1857_v23, %v1094_v25 }
 0xa1a   : > { %v2330_v28 = vadd.f32 %v1858_v26, %v1098_v27 }
 0xa1c   : > { %1750 = vmatmul.msk.f32.vlgmr.msra.gmra.mxu2 %vm535_vm0, %v2330_v28 }
 0xa9f   : > { %v1133_v30 = vpop.f32.mrf.mxu2 }
 0xaa0   : > { %v2337_v31 = vadd.f32 %v1859_v29, %v1133_v30 }
 0xaa2   : > { %1176 = vrot.lane.b32.xlu2 %v2337_v31, %s2558_s23  ;;  %1137 = vrot.lane.b32.xlu0 %v2337_v31, %s2559_s29  ;;  %s2566_s23 = smov 56   ;;  %s2567_s29 = smov 40  }
 0xaaa   : > { %1203 = vrot.lane.b32.xlu0 %v2337_v31, %s2560_s27  ;;  %s2568_s27 = smov 48  }
 0xab2   : > { %1277 = vrot.lane.b32.xlu0 %v2337_v31, %s2561_s28  ;;  %s2569_s28 = smov 8  }
 0xaba   : > { %1275 = vrot.lane.b32.xlu0 %v2337_v31, %s2562_s30  ;;  %s2570_s30 = smov 16  }
 0xafc   : > { %v1177_v33 = vpop.permute.xlu2 %1176 }
 0xafd   : > { %1197 = vmatpush.msra.mxu3 %v1177_v33 }
 0xb14   : > { %v1138_v34 = vpop.permute.xlu0 %1137 }
 0xb15   : > { %1751 = vmatpush.xpose.msk.msrb.mxu1 %vm607_vm5, %v1138_v34 }
 0xb18   : > { %1752 = vmatmul.msk.f32.vlgmr.msrb.gmra.mxu1 %vm607_vm5, %v2337_v31 }
 0xb1c   : > { %v1204_v36 = vpop.permute.xlu0 %1203 }
 0xb24   : > { %v1278_v35 = vpop.permute.xlu0 %1277 }
 0xb25   : > { %1757 = vmatpush.xpose.msk.msrb.mxu3 %vm607_vm5, %v1278_v35  ;;  %v1765_v35 = vld [vmem:[%s2517_s6 + $0x30] sm:$0xff] }
 0xb2c   : > { %v1276_v53 = vpop.permute.xlu0 %1275 }
 0xb95   : > { %v1160_v37 = vpop.f32.mrf.mxu1 }
 0xb96   : > { %v1163_v38 = vmul.f32 0.35355338, %v1160_v37  ;;  %v1764_v37 = vld [vmem:[%s2517_s6 + $0x28] sm:$0xff] }
 0xb98   : > { %v1164_v39 = vadd.f32 %v2198_v43, %v1163_v38  ;;  %v1763_v38 = vld [vmem:[%s2517_s6 + $0x20] sm:$0xff] }
 0xb9a   : > { %v1165_v40 = vsel %vm607_vm5, %v1164_v39, -inf }
 0xb9b   : > { %1166 = vmax.xlane.f32.xlu1 %v1165_v40 }
 0xbb4   : > { %1205 = vrot.lane.b32.xlu1 %v2337_v31, %s2563_s18 }
 0xbbc   : > { %1349 = vrot.lane.b32.xlu1 %v2337_v31, %s2564_s19 }
 0xc0e   : > { %v1167_v41 = vpop.xlane.xlu1 %1166 }
 0xc0f   : > { %v1168_v42 = vsub.f32 %v1164_v39, %v1167_v41 }
 0xc11   : > { %v1169_v44 = vmul.f32 1.442695, %v1168_v42  ;;  %v1860_v42 = vld [vmem:[%s2518_s7 + $0x1] ss:$0 sm:$0xff] }
 0xc13   : > { %1893 = vpow2.f32 %v1169_v44 }
 0xc19   : > { %v1894_v45 = vpop.eup %1893 }
 0xc1a   : > { %v1171_v46 = vsel %vm607_vm5, %v1894_v45, 0.0 }
 0xc1b   : > { %1172 = vadd.xlane.f32.xlu2 %v1171_v46 }
 0xc26   : > { %v1206_v47 = vpop.permute.xlu1 %1205 }
 0xc27   : > { %1754 = vmatpush.xpose.msk.msrb.mxu2 %vm607_vm5, %v1206_v47 }
 0xc2a   : > { %1755 = vmatmul.msk.f32.vlgmr.msrb.gmra.mxu2 %vm607_vm5, %v1204_v36  ;;  %v1766_v36 = vld [vmem:[%s2517_s6 + $0x38] sm:$0xff] }
 0xc2e   : > { %v1350_v48 = vpop.permute.xlu1 %1349 }
 0xc2f   : > { %1760 = vmatpush.xpose.msk.msra.mxu2 %vm607_vm5, %v1350_v48 }
 0xc33   : > { %1347 = vrot.lane.b32.xlu2 %v2337_v31, %s2565_s20 }
 0xc8e   : > { %v1173_v49 = vpop.xlane.xlu2 %1172 }
 0xc8f   : > { %1895 = vrcp.f32 %v1173_v49 }
 0xc95   : > { %v1896_v50 = vpop.eup %1895 }
 0xc96   : > { %v1175_v51 = vmul.f32 %v1896_v50, %v1894_v45  ;;  %v1348_v52 = vpop.permute.xlu2 %1347 }
 0xc97   : > { %1761 = vmatmul.msk.f32.vlgmr.msra.gmra.mxu2 %vm607_vm5, %v1348_v52 }
 0xc98   : > { %1753 = vmatmul.msk.f32.vlgmr.msra.gmra.mxu3 %vm607_vm5, %v1175_v51 }
 0xc99   : > { %1445 = vmatpush.msra.mxu3 %v1766_v36 }
 0xc9b   : > { %1446 = vmatpush.msra.mxu3 %v1765_v35 }
 0xc9d   : > { %1447 = vmatpush.msra.mxu3 %v1764_v37 }
 0xc9f   : > { %1448 = vmatpush.msra.mxu3 %v1763_v38 }
 0xca0   : > { %1758 = vmatmul.msk.f32.vlgmr.msrb.gmra.mxu3 %vm607_vm5, %v1276_v53  ;;  %v1774_v53 = vld [vmem:[%s2521_s10 + $0x38] sm:$0xff] }
 0xcad   : > { %v1228_v54 = vpop.f32.mrf.mxu2 }
 0xcae   : > { %v1231_v55 = vmul.f32 0.35355338, %v1228_v54  ;;  %v1772_v54 = vld [vmem:[%s2521_s10 + $0x28] sm:$0xff] }
 0xcb0   : > { %v1232_v56 = vadd.f32 %v2198_v43, %v1231_v55  ;;  %v1771_v55 = vld [vmem:[%s2521_s10 + $0x20] sm:$0xff] }
 0xcb2   : > { %v1233_v57 = vsel %vm607_vm5, %v1232_v56, -inf }
 0xcb3   : > { %1234 = vmax.xlane.f32.xlu1 %v1233_v57 }
 0xd1a   : > { %v1372_v32 = vpop.f32.mrf.mxu2 }
 0xd1b   : > { %v1375_v58 = vmul.f32 0.35355338, %v1372_v32  ;;  %v1199_v59 = vpop.f32.mrf.mxu3 }
 0xd1c   : > { %1202 = vst.msk [vmem:[#allocation2] sm:$0xff] %vm607_vm5, %v1199_v59 }
 0xd1d   : > { %v1376_v60 = vadd.f32 %v2198_v43, %v1375_v58 }
 0xd1f   : > { %v1377_v61 = vsel %vm607_vm5, %v1376_v60, -inf }
 0xd20   : > { %1378 = vmax.xlane.f32.xlu2 %v1377_v61 }
 0xd23   : > { %v1300_v62 = vpop.f32.mrf.mxu3 }
 0xd24   : > { %v1303_v63 = vmul.f32 0.35355338, %v1300_v62 }
 0xd26   : > { %v1235_v0 = vpop.xlane.xlu1 %1234  ;;  %v1304_v1 = vadd.f32 %v2198_v43, %v1303_v63 }
 0xd27   : > { %v1236_v2 = vsub.f32 %v1232_v56, %v1235_v0  ;;  %v1861_v0 = vld [vmem:[%s2519_s8 + $0x1] ss:$0 sm:$0xff] }
 0xd28   : > { %v1305_v3 = vsel %vm607_vm5, %v1304_v1, -inf }
 0xd29   : > { %v1237_v4 = vmul.f32 1.442695, %v1236_v2  ;;  %1306 = vmax.xlane.f32.xlu0 %v1305_v3  ;;  %v1862_v3 = vld [vmem:[%s2520_s9 + $0x1] ss:$0 sm:$0xff] }
 0xd2b   : > { %1897 = vpow2.f32 %v1237_v4 }
 0xd31   : > { %v1898_v5 = vpop.eup %1897 }
 0xd32   : > { %v1239_v6 = vsel %vm607_vm5, %v1898_v5, 0.0 }
 0xd33   : > { %1240 = vadd.xlane.f32.xlu1 %v1239_v6  ;;  %v1863_v6 = vld [vmem:[%s2522_s11 + $0x1] ss:$0 sm:$0xff] }
 0xd4c   : > { %1244 = vrot.lane.b32.xlu1 %v2337_v31, %s2566_s23 }
 0xd93   : > { %v1379_v7 = vpop.xlane.xlu2 %1378 }
 0xd94   : > { %v1380_v9 = vsub.f32 %v1376_v60, %v1379_v7 }
 0xd96   : > { %v1381_v10 = vmul.f32 1.442695, %v1380_v9 }
 0xd98   : > { %1899 = vpow2.f32 %v1381_v10 }
 0xd9c   : > { %v1307_v11 = vpop.xlane.xlu0 %1306 }
 0xd9d   : > { %v1308_v12 = vsub.f32 %v1304_v1, %v1307_v11 }
 0xd9e   : > { %v1900_v43 = vpop.eup %1899 }
 0xd9f   : > { %v1309_v13 = vmul.f32 1.442695, %v1308_v12  ;;  %v1383_v14 = vsel %vm607_vm5, %v1900_v43, 0.0 }
 0xda0   : > { %1384 = vadd.xlane.f32.xlu2 %v1383_v14 }
 0xda1   : > { %1901 = vpow2.f32 %v1309_v13 }
 0xda6   : > { %v1241_v17 = vpop.xlane.xlu1 %1240 }
 0xda7   : > { %v1902_v15 = vpop.eup %1901  ;;  %1903 = vrcp.f32 %v1241_v17 }
 0xda8   : > { %v1311_v16 = vsel %vm607_vm5, %v1902_v15, 0.0 }
 0xda9   : > { %1312 = vadd.xlane.f32.xlu0 %v1311_v16 }
 0xdad   : > { %v1904_v18 = vpop.eup %1903 }
 0xdae   : > { %v1243_v19 = vmul.f32 %v1904_v18, %v1898_v5  ;;  %v1783_v18 = vld [vmem:[%s2523_s12 + $0x68] sm:$0xff] }
 0xdb8   : > { %1388 = vrot.lane.b32.xlu2 %v2337_v31, %s2567_s29 }
 0xdbd   : > { %1316 = vrot.lane.b32.xlu0 %v2337_v31, %s2568_s27 }
 0xdbe   : > { %v1245_v20 = vpop.permute.xlu1 %1244 }
 0xdbf   : > { %1265 = vmatpush.msra.mxu1 %v1245_v20 }
 0xdc0   : > { %1756 = vmatmul.msk.f32.vlgmr.msra.gmra.mxu1 %vm607_vm5, %v1243_v19 }
 0xe13   : > { %v1385_v21 = vpop.xlane.xlu2 %1384 }
 0xe14   : > { %1905 = vrcp.f32 %v1385_v21  ;;  %v1782_v21 = vld [vmem:[%s2523_s12 + $0x60] sm:$0xff] }
 0xe1a   : > { %v1906_v22 = vpop.eup %1905 }
 0xe1b   : > { %v1387_v23 = vmul.f32 %v1906_v22, %v1900_v43  ;;  %v1389_v24 = vpop.permute.xlu2 %1388  ;;  %v1785_v43 = vld [vmem:[%s2523_s12 + $0x78] sm:$0xff] }
 0xe1c   : > { %1409 = vmatpush.msrb.mxu1 %v1389_v24  ;;  %v1313_v25 = vpop.xlane.xlu0 %1312  ;;  %1590 = vmatpush.msrb.mxu2 %v1785_v43  ;;  %v1865_v43 = vld [vmem:[%s2525_s14 + $0x1] ss:$0 sm:$0xff] }
 0xe1d   : > { %1762 = vmatmul.msk.f32.vlgmr.msrb.gmra.mxu1 %vm607_vm5, %v1387_v23  ;;  %1907 = vrcp.f32 %v1313_v25  ;;  %v1781_v23 = vld [vmem:[%s2523_s12 + $0x58] sm:$0xff] }
 0xe23   : > { %v1908_v26 = vpop.eup %1907 }
 0xe24   : > { %v1315_v27 = vmul.f32 %v1908_v26, %v1902_v15  ;;  %v1784_v15 = vld [vmem:[%s2523_s12 + $0x70] sm:$0xff] }
 0xe25   : > { %1591 = vmatpush.msrb.mxu2 %v1784_v15  ;;  %v1780_v26 = vld [vmem:[%s2523_s12 + $0x50] sm:$0xff] }
 0xe27   : > { %1592 = vmatpush.msrb.mxu2 %v1783_v18 }
 0xe29   : > { %1593 = vmatpush.msrb.mxu2 %v1782_v21 }
 0xe2b   : > { %1594 = vmatpush.msrb.mxu2 %v1781_v23 }
 0xe2d   : > { %1595 = vmatpush.msrb.mxu2 %v1780_v26 }
 0xe2f   : > { %v1317_v29 = vpop.permute.xlu0 %1316 }
 0xe30   : > { %1337 = vmatpush.msrb.mxu0 %v1317_v29  ;;  %v1779_v29 = vld [vmem:[%s2523_s12 + $0x48] sm:$0xff] }
 0xe31   : > { %1759 = vmatmul.msk.f32.vlgmr.msrb.gmra.mxu0 %vm607_vm5, %v1315_v27  ;;  %1596 = vmatpush.msrb.mxu2 %v1779_v29 }
 0xe32   : > { %1513 = vmatpush.msra.mxu0 %v1774_v53 }
 0xe3d   : > { %v1267_v30 = vpop.f32.mrf.mxu1 }
 0xe3e   : > { %1271 = vrot.lane.b32.xlu0 %v1267_v30, %s2569_s28 }
 0xe9a   : > { %v1411_v31 = vpop.f32.mrf.mxu1 }
 0xe9b   : > { %1415 = vrot.lane.b32.xlu2 %v1411_v31, %s1993_s26  ;;  %v1778_v31 = vld [vmem:[%s2523_s12 + $0x40] sm:$0xff]  ;;  %s521_s26 = sand.u32 1, %s1969_s22  }
 0xe9c   : > { %1597 = vmatpush.msrb.mxu2 %v1778_v31  ;;  %s1726_s28 = sshll.u32 %s521_s26, 3  ;;  %s1639_s18 = scalar_lea.sflag [#allocation4], %s521_s26 }
 0xe9d   : > { %s523_s2 = scalar_lea.vmem [#allocation3], %s1726_s28  ;;  %s1935_s28 = scalar_lea.hbm %s2527_s16, 16 }
 0xeae   : > { %v1339_v33 = vpop.f32.mrf.mxu0 }
 0xeaf   : > { %1343 = vrot.lane.b32.xlu1 %v1339_v33, %s2570_s30  ;;  %s1791_s30 = sshll.u32 %s2100_s25, 3  ;;  %s1651_s25 = sshll.u32 %s523_s2, 4  ;;  %s1652_s25 = int_to_ptr.vmem [resolvable:$true] %s1651_s25 }
 0xeb0   : > { %v1272_v34 = vpop.permute.xlu0 %1271  ;;  %s1649_s29 = scalar_lea.hbm %s2527_s16, %s1791_s30 }
 0xeb1   : > { %1274 = vst.msk [vmem:[#allocation2] sm:$0xff] %vm746_vm6, %v1272_v34  ;;  %s1653_s3 = sshll.u32 %s1649_s29, 4  ;;  %s1654_s3 = int_to_ptr.hbm [resolvable:$true] %s1653_s3 }
 0xeb2   : > { %s1929_s19 = sshra.s32 %s1654_s3, 4  ;;  %s1930_s19 = int_to_ptr.hbm [resolvable:$true] %s1929_s19 }
 0xeb3   : > { %s1931_s30 = scalar_lea.hbm %s1930_s19, 8  ;;  %p1936_p0 = scmp.lt.s32.totalorder %s1930_s19, %s2527_s16 }
 0xeb4   : > { %p1932_p11 = scmp.ne.s32.totalorder %s1930_s19, %s1931_s30  ;;  %p1937_p1 = scmp.lt.s32.totalorder %s1935_s28, %s1931_s30 }
 0xeb6   : > { %p1933_p12 = pnand %p1932_p11, %p2117_p5  ;;  %p1938_p2 = por %p1937_p1, %p1936_p0 }
 0xeb8   : > { %p1934_p13 = pneg %p1933_p12 }
 0xeba   : > { %p1939_p3 = pnand %p1938_p2, %p1934_p13 }
 0xef5   : > { %v1416_v40 = vpop.permute.xlu2 %1415 }
 0xf21   : > { %v1344_v39 = vpop.permute.xlu1 %1343 }
 0xf22   : > { %1346 = vst.msk [vmem:[#allocation2] sm:$0xff] %vm819_vm7, %v1344_v39 }
 0xf23   : > { %1418 = vst.msk [vmem:[#allocation2] sm:$0xff] %vm892_vm8, %v1416_v40 }
 0xf2a   : > { %v1419_v41 = vld [vmem:[#allocation2] sm:$0xff] }
 0xf2b   : > { %1768 = vmatmul.msk.f32.vlgmr.msra.gmra.mxu3 %vm535_vm0, %v1419_v41 }
 0xfae   : > { %v1450_v44 = vpop.f32.mrf.mxu3 }
 0xfaf   : > { %v1451_v45 = vadd.f32 %v1860_v42, %v1450_v44 }
 0xfb1   : > { %v1453_v46 = vadd.f32 %v1451_v45, %v2330_v28  ;;  %v1773_v28 = vld [vmem:[%s2521_s10 + $0x30] sm:$0xff] }
 0xfb2   : > { %1514 = vmatpush.msra.mxu0 %v1773_v28 }
 0xfb3   : > { %v1458_v47 = vsel %vm535_vm0, %v1453_v46, 0.0 }
 0xfb4   : > { %1459 = vadd.xlane.f32.xlu0 %v1458_v47  ;;  %1515 = vmatpush.msra.mxu0 %v1772_v54 }
 0xfb6   : > { %1516 = vmatpush.msra.mxu0 %v1771_v55 }
0x1027   : > { %v1460_v48 = vpop.xlane.xlu0 %1459 }
0x1028   : > { %v1461_v49 = vmul.f32 %v1460_v48, %v2140_v8 }
0x102a   : > { %v1462_v50 = vsub.f32 %v1453_v46, %v1461_v49 }
0x102c   : > { %v1463_v51 = vmul.f32 %v1462_v50, %v1462_v50 }
0x102e   : > { %v1464_v52 = vsel %vm535_vm0, %v1463_v51, 0.0 }
0x102f   : > { %1465 = vadd.xlane.f32.xlu1 %v1464_v52 }
0x10a2   : > { %v1466_v56 = vpop.xlane.xlu1 %1465 }
0x10a3   : > { %v1467_v57 = vmul.f32 %v1466_v56, %v2140_v8 }
0x10a5   : > { %v1468_v32 = vadd.f32 1e-05, %v1467_v57 }
0x10a7   : > { %1909 = vrsqrt.f32 %v1468_v32  ;;  %vm1475_vm6 = vweird.f32 %v1468_v32 }
0x10ad   : > { %v1910_v58 = vpop.eup %1909 }
0x10ae   : > { %v1470_v59 = vmul.f32 %v1910_v58, %v1468_v32  ;;  %vm1476_vm5 = vweird.f32 %v1910_v58  ;;  %v1864_v32 = vld [vmem:[%s2524_s13 + $0x1] ss:$0 sm:$0xff] }
0x10af   : > { %vm1477_vm7 = vmor %vm1475_vm6, %vm1476_vm5 }
0x10b0   : > { %v1471_v60 = vmul.f32 %v1910_v58, %v1470_v59 }
0x10b2   : > { %v1472_v61 = vmul.f32 0.5, %v1471_v60 }
0x10b4   : > { %v1473_v62 = vsub.f32 1.5, %v1472_v61 }
0x10b6   : > { %v1474_v63 = vmul.f32 %v1910_v58, %v1473_v62 }
0x10b8   : > { %v1478_v1 = vsel %vm1477_vm7, %v1910_v58, %v1474_v63 }
0x10b9   : > { %v1479_v2 = vmul.f32 %v1478_v1, %v1462_v50 }
0x10bb   : > { %v1483_v4 = vmul.f32 %v1861_v0, %v1479_v2 }
0x10bd   : > { %v2432_v5 = vadd.f32 %v1862_v3, %v1483_v4 }
0x10bf   : > { %1776 = vmatmul.msk.f32.vlgmr.msra.gmra.mxu0 %vm535_vm0, %v2432_v5 }
0x113c   : > { %v1518_v7 = vpop.f32.mrf.mxu0 }
0x113d   : > { %v1519_v9 = vadd.f32 %v1863_v6, %v1518_v7 }
0x113f   : > { %v1522_v10 = vmul.f32 0.70710677, %v1519_v9  ;;  %v1521_v55 = vmul.f32 0.5, %v1519_v9 }
0x1141   : > { %v1523_v11 = vmul.f32 %v1522_v10, %v1522_v10 }
0x1143   : > { %v1524_v12 = vmin.f32 %v1523_v11, 16.0 }
0x1145   : > { %v1525_v13 = vmul.f32 2.1237322e-06, %v1524_v12  ;;  %v1536_v14 = vmul.f32 3.8918573e-05, %v1524_v12 }
0x1147   : > { %v1526_v16 = vadd.f32 0.00028619796, %v1525_v13  ;;  %v1537_v17 = vadd.f32 0.001143296, %v1536_v14  ;;  %v1866_v14 = vld [vmem:[%s2526_s15 + $0x1] ss:$0 sm:$0xff] }
0x1149   : > { %v1527_v19 = vmul.f32 %v1526_v16, %v1524_v12  ;;  %v1538_v20 = vmul.f32 %v1537_v17, %v1524_v12 }
0x114b   : > { %v1539_v22 = vadd.f32 0.014752088, %v1538_v20  ;;  %v1528_v24 = vadd.f32 0.0036580483, %v1527_v19 }
0x114d   : > { %v1540_v25 = vmul.f32 %v1539_v22, %v1524_v12  ;;  %v1529_v30 = vmul.f32 %v1528_v24, %v1524_v12 }
0x114f   : > { %v1541_v27 = vadd.f32 0.112945676, %v1540_v25  ;;  %v1530_v36 = vadd.f32 0.05243302, %v1529_v30 }
0x1151   : > { %v1542_v33 = vmul.f32 %v1541_v27, %v1524_v12  ;;  %v1531_v38 = vmul.f32 %v1530_v36, %v1524_v12 }
0x1153   : > { %v1543_v34 = vadd.f32 0.4994258, %v1542_v33  ;;  %v1532_v39 = vadd.f32 0.18741608, %v1531_v38 }
0x1155   : > { %v1544_v35 = vmul.f32 %v1543_v34, %v1524_v12  ;;  %v1533_v41 = vmul.f32 %v1532_v39, %v1524_v12 }
0x1157   : > { %v1545_v37 = vadd.f32 1.0, %v1544_v35  ;;  %v1534_v46 = vadd.f32 1.1283791, %v1533_v41 }
0x1159   : > { %1911 = vrcp.f32 %v1545_v37  ;;  %v1557_v45 = vand.u32 2147483648, %v1545_v37  ;;  %v1555_v48 = vand.u32 2147483647, %v1545_v37  ;;  %vm1551_vm9 = vweird.f32 %v1545_v37 }
0x115a   : > { %v1535_v51 = vmul.f32 %v1534_v46, %v1522_v10 }
0x115b   : > { %v1558_v50 = vor.u32 1.1754944e-38, %v1557_v45  ;;  %vm1556_vm11 = vcmp.eq.f32.partialorder %v1555_v48, 8.507059e+37 }
0x115f   : > { %v1912_v40 = vpop.eup %1911 }
0x1160   : > { %v1547_v42 = vmul.f32 %v1912_v40, %v1545_v37  ;;  %vm1552_vm8 = vweird.f32 %v1912_v40 }
0x1161   : > { %vm1553_vm10 = vmor %vm1551_vm9, %vm1552_vm8 }
0x1162   : > { %v1548_v44 = vsub.f32 1.0, %v1547_v42 }
0x1164   : > { %v1549_v47 = vmul.f32 %v1912_v40, %v1548_v44 }
0x1166   : > { %v1550_v49 = vadd.f32 %v1912_v40, %v1549_v47 }
0x1168   : > { %v1554_v52 = vsel %vm1553_vm10, %v1912_v40, %v1550_v49 }
0x1169   : > { %v1559_v53 = vsel %vm1556_vm11, %v1558_v50, %v1554_v52 }
0x116a   : > { %v1560_v28 = vmul.f32 %v1559_v53, %v1535_v51 }
0x116c   : > { %v1777_v54 = vclamps-f32 %v1560_v28, 1.0 }
0x116e   : > { %v1563_v56 = vadd.f32 1.0, %v1777_v54 }
0x1170   : > { %v1564_v57 = vmul.f32 %v1563_v56, %v1521_v55 }
0x1172   : > { %1787 = vmatmul.msk.f32.vlgmr.msrb.gmra.mxu2 %vm1046_vm1, %v1564_v57 }
0x11f5   : > { %v1599_v58 = vpop.f32.mrf.mxu2 }
0x11f6   : > { %v1600_v59 = vadd.f32 %v1864_v32, %v1599_v58 }
0x11f8   : > { %v1602_v60 = vadd.f32 %v1600_v59, %v2432_v5 }
0x11fa   : > { %v1607_v61 = vsel %vm535_vm0, %v1602_v60, 0.0 }
0x11fb   : > { %1608 = vadd.xlane.f32.xlu2 %v1607_v61 }
0x126e   : > { %v1609_v62 = vpop.xlane.xlu2 %1608 }
0x126f   : > { %v1610_v63 = vmul.f32 %v1609_v62, %v2140_v8 }
0x1271   : > { %v1611_v0 = vsub.f32 %v1602_v60, %v1610_v63 }
0x1273   : > { %v1612_v1 = vmul.f32 %v1611_v0, %v1611_v0 }
0x1275   : > { %v1613_v2 = vsel %vm535_vm0, %v1612_v1, 0.0 }
0x1276   : > { %1614 = vadd.xlane.f32.xlu0 %v1613_v2 }
0x12e9   : > { %v1615_v3 = vpop.xlane.xlu0 %1614 }
0x12ea   : > { %v1616_v4 = vmul.f32 %v1615_v3, %v2140_v8 }
0x12ec   : > { %v1617_v6 = vadd.f32 1e-05, %v1616_v4 }
0x12ee   : > { %1913 = vrsqrt.f32 %v1617_v6  ;;  %vm1624_vm13 = vweird.f32 %v1617_v6 }
0x12f4   : > { %v1914_v7 = vpop.eup %1913 }
0x12f5   : > { %v1619_v5 = vmul.f32 %v1914_v7, %v1617_v6  ;;  %vm1625_vm12 = vweird.f32 %v1914_v7 }
0x12f6   : > { %vm1626_vm14 = vmor %vm1624_vm13, %vm1625_vm12 }
0x12f7   : > { %v1620_v9 = vmul.f32 %v1914_v7, %v1619_v5 }
0x12f9   : > { %v1621_v10 = vmul.f32 0.5, %v1620_v9 }
0x12fb   : > { %v1622_v11 = vsub.f32 1.5, %v1621_v10 }
0x12fd   : > { %v1623_v12 = vmul.f32 %v1914_v7, %v1622_v11 }
0x12ff   : > { %v1627_v8 = vsel %vm1626_vm14, %v1914_v7, %v1623_v12 }
0x1300   : > { %v1628_v13 = vmul.f32 %v1627_v8, %v1611_v0 }
0x1302   : > { %v1632_v15 = vmul.f32 %v1865_v43, %v1628_v13 }
0x1304   : > { %v1636_v16 = vadd.f32 %v1866_v14, %v1632_v15 }
0x1306   : > { %1637 = vst.msk [vmem:[%s523_s2] sm:$0xff] %vm535_vm0, %v1636_v16 }
0x1307   : > { %1942 = shalt.err (!%p1939_p3)
}
0x1308   : > { %1794 = dma.vmem_to_hbm [thread:$0]  (%p2117_p5), %s1652_s25, 128, %s1654_s3, %s1639_s18  }
0x1309 PF: > { %p1800_p4 = scmp.ge.s32.totalorder %s1977_s24, 2  ;;  %s1665_s2 = sand.u32 1, %s1965_s21  }
0x130a   : > { %s1666_s26 = scalar_lea.sflag [#allocation4], %s1665_s2 }
0x130b   : > { %p1797_p7 = pnand %p1800_p4, %p2121_p6 }
0x130d   : > { %p1798_p8 = pneg %p1797_p7 }
0x130f   : > { %1960 = dma.done.wait (%p1798_p8), %s1666_s26, 128  }
0x1310   : > { %1962 = vsyncadd (%p1798_p8), %s1666_s26, 4294967168  ;;  %s2571_s24 = sld [smem:[#allocation7_spill]]  ;;  %s2574_s21 = smov %s1969_s22 }
0x1311   : > { %s2572_s27 = sld [smem:[#allocation6_spill]] }
0x1312   : > { %s2573_s23 = sld [smem:[#allocation8_spill]] }
0x1316   : > { %p26_p9 = scmp.ge.s32.totalorder %s2571_s24, 4  }
0x1317   : > { %s2575_s22 = smov %s2572_s27 }
0x1318   :  { %28 = sbr.rel (!%p26_p9) target bundleno = 8 (0x8), region = 134 }
0x131d   :  { %1672 = vsyncpa [#allocation4], 1 }
0x131e   :  { %1674 = vsyncpa [#allocation4 + $0x1], 1 }

</bundles_post_ra>
